<compile_context>
chip_gen: v7x
topology: tpu7x:2x2x1
jax: 0.10.0
libtpu: 0.0.40
codegen_flags: <defaults>
</compile_context>

<pallas_src>
import functools

import numpy as np
import jax
import jax.numpy as jnp
from jax import lax
from jax.experimental import pallas as pl
from jax.experimental.pallas import tpu as pltpu


def _round_up(x, m):
    return (x + m - 1) // m * m


# ---------------------------------------------------------------------------
# Kernel: one grid step = one direction (parallel axis) x one time chunk.
# ---------------------------------------------------------------------------
def gru_recurrence_kernel(t_pad, gi_ref, lens_ref, whh_ref, bhhn_ref,
                          hout_ref, h_ref):
    """Serial GRU recurrence for a single direction over one time chunk.

    gi_ref  : (Tc, Bp, 3Hp) precomputed x@Wih + bih (+ bhh_r, bhh_z folded),
              chunk i for the forward direction, chunk Nc-1-i (natural time
              order) for the backward direction.
    lens_ref: (Bp, 1) int32 valid lengths.
    whh_ref : (Hp, 3Hp) gate-fused hidden weights (gate order [r, z, n]).
    bhhn_ref: (1, Hp) n-gate hidden bias (must stay inside r * (...)).
    hout_ref: (Bp, Hp) final hidden for this direction (written on last chunk).
    h_ref   : (Bp, Hp) f32 carried hidden state (VMEM scratch).
    """
    Tc, Bp, G = gi_ref.shape
    Hp = whh_ref.shape[0]
    d = pl.program_id(0)          # 0 = forward, 1 = backward
    i = pl.program_id(1)          # time-chunk index (processing order)

    @pl.when(i == 0)
    def _init():
        h_ref[...] = jnp.zeros_like(h_ref)

    lens = lens_ref[...]                          # (Bp, 1) int32
    whh = whh_ref[...]                            # (Hp, 3Hp) matmul dtype
    bhhn = bhhn_ref[...].astype(jnp.float32)      # (1, Hp)

    def step(s, h):
        p = i * Tc + s                               # processing position
        row = (1 - d) * s + d * (Tc - 1 - s)         # row inside streamed chunk
        t = (1 - d) * p + d * (t_pad - 1 - p)        # global time index
        gi = gi_ref[row].astype(jnp.float32)         # (Bp, 3Hp)
        gh = jnp.dot(h.astype(whh.dtype), whh,
                     preferred_element_type=jnp.float32)
        # PyTorch GRU cell (gate order r, z, n); r/z hidden biases are folded
        # into gi, only the n-gate hidden bias stays inside the r* multiply.
        r = jax.nn.sigmoid(gi[:, :Hp] + gh[:, :Hp])
        z = jax.nn.sigmoid(gi[:, Hp:2 * Hp] + gh[:, Hp:2 * Hp])
        n = jnp.tanh(gi[:, 2 * Hp:] + r * (gh[:, 2 * Hp:] + bhhn))
        h_new = (1.0 - z) * n + z * h
        # pack_padded_sequence semantics: only valid (t < len) steps update.
        return jnp.where(t < lens, h_new, h)

    # Unroll gated on Hp: tiny chunks fully unroll; at Hp>=1024 two live
    # unrolled iterations already stress the vreg file, so keep it at 2.
    unroll = Tc if Tc <= 8 else (4 if Hp <= 512 else 2)
    h_ref[...] = lax.fori_loop(0, Tc, step, h_ref[...], unroll=unroll)

    @pl.when(i == pl.num_programs(1) - 1)
    def _finalize():
        hout_ref[...] = h_ref[...]


# ---------------------------------------------------------------------------
# Wrapper: fuse/pad weights, precompute gi in XLA, run the recurrent kernel.
# ---------------------------------------------------------------------------
def elmo_gru_forward(embedded, input_len, params, *, time_chunk=32,
                     matmul_dtype=jnp.float32, single_buffer_weights=True):
    """embedded: (B, T, E) float (stand-in for ELMo output); input_len: (B,) ints."""
    f32 = jnp.float32
    B, T, E = embedded.shape
    H = params["whh_f"].shape[1]

    # Hardware-tile padding: lane dims -> 128, sublane (batch) -> 8.
    Bp = _round_up(B, 8)
    Hp = _round_up(H, 128)
    G = 3 * Hp
    Tc = min(time_chunk, max(T, 1))
    Tp = _round_up(T, Tc)
    Nc = Tp // Tc
    stream_dtype = matmul_dtype          # dtype of the streamed gi chunks

    # ---- Input-to-hidden gate fusion; fold bih (all gates) + bhh (r, z only).
    def fuse_ih(wih, bih, bhh):
        W = jnp.zeros((E, G), f32)
        bias = jnp.zeros((1, G), f32)
        for g in range(3):
            W = W.at[:, g * Hp:g * Hp + H].set(wih[g].astype(f32))
            bfold = bih[g].astype(f32) + (bhh[g].astype(f32) if g < 2 else 0.0)
            bias = bias.at[:, g * Hp:g * Hp + H].set(bfold)
        return W, bias

    wih_f, bfold_f = fuse_ih(params["wih_f"], params["bih_f"], params["bhh_f"])
    wih_b, bfold_b = fuse_ih(params["wih_b"], params["bih_b"], params["bhh_b"])

    # ---- Hidden-to-hidden fused weights (2, Hp, 3Hp) + n-gate hidden bias.
    whh = jnp.zeros((2, Hp, G), f32)
    bhhn = jnp.zeros((2, 1, Hp), f32)
    for dir_idx, (wk, bk) in enumerate((("whh_f", "bhh_f"), ("whh_b", "bhh_b"))):
        for g in range(3):
            whh = whh.at[dir_idx, :H, g * Hp:g * Hp + H].set(params[wk][g].astype(f32))
        bhhn = bhhn.at[dir_idx, :, :H].set(params[bk][2].astype(f32))
    whh = whh.astype(matmul_dtype)

    # ---- Hoisted input projection: one big dense matmul per direction in XLA
    # (full MXU row utilization; the Pallas kernel only gets the serial chain).
    x_tm = jnp.transpose(embedded, (1, 0, 2)).astype(f32)            # (T, B, E)
    x_pad = jnp.zeros((Tp, Bp, E), f32).at[:T, :B, :].set(x_tm)
    xm = x_pad.astype(matmul_dtype)
    gi_f = jnp.einsum("tbe,eg->tbg", xm, wih_f.astype(matmul_dtype),
                      preferred_element_type=f32) + bfold_f
    gi_b = jnp.einsum("tbe,eg->tbg", xm, wih_b.astype(matmul_dtype),
                      preferred_element_type=f32) + bfold_b
    gi = jnp.stack([gi_f, gi_b], axis=0).astype(stream_dtype)        # (2,Tp,Bp,G)

    lens = jnp.zeros((Bp, 1), jnp.int32).at[:B, 0].set(
        jnp.asarray(input_len, jnp.int32))

    # ---- Explicit VMEM budget (capped at 64 MiB: safe on v7x and v5e/v6e).
    s_it = jnp.dtype(stream_dtype).itemsize
    w_it = jnp.dtype(matmul_dtype).itemsize
    w_bufs = 1 if single_buffer_weights else 2
    footprint = (2 * Tc * Bp * G * s_it                   # gi chunk, double-buffered
                 + w_bufs * (Hp * G * w_it + 128 * 4 + 8 * 128 * 4)  # whh+bhhn+lens
                 + 2 * Bp * Hp * 4                        # output block
                 + Bp * Hp * 4)                           # h carry scratch
    vmem_limit = int(min(64 << 20, max(16 << 20, 2 * footprint + (2 << 20))))

    def const_spec(shape, index_map, single_buffer):
        if single_buffer:
            # Grid-invariant operand: one VMEM buffer instead of the default 2.
            return pl.BlockSpec(shape, index_map,
                                pipeline_mode=pl.Buffered(buffer_count=1))
        return pl.BlockSpec(shape, index_map)

    def call(single_buffer):
        grid_spec = pltpu.PrefetchScalarGridSpec(
            num_scalar_prefetch=0,
            grid=(2, Nc),                                  # (direction, time chunk)
            in_specs=[
                # fwd streams chunk i, bwd streams chunk Nc-1-i (each gi array
                # is read exactly once per call).
                pl.BlockSpec((None, Tc, Bp, G),
                             lambda d, i: (d, i + d * (Nc - 1 - 2 * i), 0, 0)),
                const_spec((Bp, 1), lambda d, i: (0, 0), single_buffer),
                const_spec((None, Hp, G), lambda d, i: (d, 0, 0), single_buffer),
                const_spec((None, 1, Hp), lambda d, i: (d, 0, 0), single_buffer),
            ],
            out_specs=pl.BlockSpec((None, Bp, Hp), lambda d, i: (d, 0, 0)),
            scratch_shapes=[pltpu.VMEM((Bp, Hp), jnp.float32)],      # h carry
        )
        return pl.pallas_call(
            functools.partial(gru_recurrence_kernel, Tp),
            out_shape=jax.ShapeDtypeStruct((2, Bp, Hp), jnp.float32),
            grid_spec=grid_spec,
            compiler_params=pltpu.CompilerParams(
                dimension_semantics=("parallel", "arbitrary"),
                vmem_limit_bytes=vmem_limit),
        )(gi, lens, whh, bhhn)

    if single_buffer_weights:
        try:
            h_out = jax.block_until_ready(call(True))
        except Exception:
            # Fallback if pl.Buffered(1) is not supported by this jax build.
            h_out = call(False)
    else:
        h_out = call(False)

    # ---- Final relu + fc is a tiny (B, 2H) @ (2H, O): plain XLA.
    h_f = h_out[0, :B, :H]
    h_b = h_out[1, :B, :H]
    feats = jnp.maximum(jnp.concatenate([h_f, h_b], axis=-1), 0.0)
    return feats @ params["wfc"].astype(f32) + params["bfc"].astype(f32)


# ---------------------------------------------------------------------------
# Parameters + pure-JAX reference
# ---------------------------------------------------------------------------
def init_params(key, E, H, O):
    """Synthetic parameters, PyTorch-style uniform(-1/sqrt(H), 1/sqrt(H))."""
    bound = 1.0 / np.sqrt(H)
    keys = jax.random.split(key, 10)
    u = lambda k, shape: jax.random.uniform(k, shape, jnp.float32, -bound, bound)
    return dict(
        # forward direction GRU (gate order r, z, n)
        wih_f=u(keys[0], (3, E, H)), whh_f=u(keys[1], (3, H, H)),
        bih_f=u(keys[2], (3, 1, H)), bhh_f=u(keys[3], (3, 1, H)),
        # backward direction GRU
        wih_b=u(keys[4], (3, E, H)), whh_b=u(keys[5], (3, H, H)),
        bih_b=u(keys[6], (3, 1, H)), bhh_b=u(keys[7], (3, 1, H)),
        # final linear: nn.Linear(2H, O), stored pre-transposed as (2H, O)
        wfc=u(keys[8], (2 * H, O)), bfc=u(keys[9], (1, O)),
    )


def _gru_step_ref(x_t, h_prev, wih, whh, bih, bhh):
    gi_r = x_t @ wih[0] + bih[0]
    gi_z = x_t @ wih[1] + bih[1]
    gi_n = x_t @ wih[2] + bih[2]
    gh_r = h_prev @ whh[0] + bhh[0]
    gh_z = h_prev @ whh[1] + bhh[1]
    gh_n = h_prev @ whh[2] + bhh[2]
    r = jax.nn.sigmoid(gi_r + gh_r)
    z = jax.nn.sigmoid(gi_z + gh_z)
    n = jnp.tanh(gi_n + r * gh_n)
    return (1.0 - z) * n + z * h_prev


def reference_forward(embedded, input_len, params):
    """Pure-JAX reference of the same masked bidirectional GRU -> relu -> fc."""
    B, T, E = embedded.shape
    H = params["whh_f"].shape[1]
    lens = jnp.asarray(input_len, jnp.int32).reshape(B, 1)
    x_tm = jnp.transpose(embedded, (1, 0, 2)).astype(jnp.float32)
    h_f = jnp.zeros((B, H), jnp.float32)
    h_b = jnp.zeros((B, H), jnp.float32)
    for t in range(T):
        tb = T - 1 - t
        hf_new = _gru_step_ref(x_tm[t], h_f, params["wih_f"], params["whh_f"],
                               params["bih_f"], params["bhh_f"])
        hb_new = _gru_step_ref(x_tm[tb], h_b, params["wih_b"], params["whh_b"],
                               params["bih_b"], params["bhh_b"])
        h_f = jnp.where(t < lens, hf_new, h_f)
        h_b = jnp.where(tb < lens, hb_new, h_b)
    feats = jnp.maximum(jnp.concatenate([h_f, h_b], axis=-1), 0.0)
    return feats @ params["wfc"] + params["bfc"]


if __name__ == "__main__":
    # Small shapes consistent with the module's forward:
    # batch=2, seq=8, embed_dim=32, hidden_size=32, output_size=2.
    B, T, E, H, O = 2, 8, 32, 32, 2

    key = jax.random.PRNGKey(0)
    k_params, k_embed = jax.random.split(key)
    params = init_params(k_params, E, H, O)

    # TODO(synk): the ELMo character embedder (allennlp Elmo + batch_to_ids) has
    # no Pallas equivalent; the already-embedded (B, T, E) sequence is the input.
    embedded = jax.random.normal(k_embed, (B, T, E), jnp.float32)
    # pack_padded_sequence(enforce_sorted=True) requires descending lengths.
    input_len = jnp.array([8, 5], dtype=jnp.int32)

    ref = reference_forward(embedded, input_len, params)

    # f32 configuration (strict correctness check); time_chunk=4 -> 2 time
    # chunks per direction, exercising the cross-chunk hidden-state carry.
    out_f32 = elmo_gru_forward(embedded, input_len, params,
                               time_chunk=4, matmul_dtype=jnp.float32)
    out_f32 = jax.block_until_ready(out_f32)
    np.testing.assert_allclose(np.asarray(out_f32), np.asarray(ref),
                               rtol=1e-4, atol=1e-4)

    # bf16 matmul-operand configuration (the performance setting): loose
    # sanity check only, since bf16 rounding propagates through the recurrence.
    out_bf16 = elmo_gru_forward(embedded, input_len, params,
                                time_chunk=4, matmul_dtype=jnp.bfloat16)
    out_bf16 = jax.block_until_ready(out_bf16)
    np.testing.assert_allclose(np.asarray(out_bf16), np.asarray(ref),
                               rtol=1e-1, atol=1e-1)

    print("KERNEL_OK")
</pallas_src>

<mosaic_0001>
module attributes {stable_mosaic.version = 11 : i64} {
  func.func @gru_recurrence_kernel(%arg0: i32, %arg1: i32, %arg2: memref<1x4x8x384xf32, #tpu.memory_space<vmem>>, %arg3: memref<8x1xi32, #tpu.memory_space<vmem>>, %arg4: memref<1x128x384xf32, #tpu.memory_space<vmem>>, %arg5: memref<1x1x128xf32, #tpu.memory_space<vmem>>, %arg6: memref<1x8x128xf32, #tpu.memory_space<vmem>>, %arg7: memref<8x128xf32, #tpu.memory_space<vmem>>) attributes {dimension_semantics = [#tpu.dimension_semantics<parallel>, #tpu.dimension_semantics<arbitrary>], iteration_bounds = array<i64: 2, 2>, scalar_prefetch = 0 : i64, scratch_operands = 1 : i64, tpu.core_type = #tpu.core_type<tc>, window_params = [{transform_indices = @transform_0, window_bounds = array<i64: 1, 4, 8, 384>}, {pipeline_mode = #tpu.pipeline_mode<synchronous>, transform_indices = @transform_1, window_bounds = array<i64: 8, 1>}, {pipeline_mode = #tpu.pipeline_mode<synchronous>, transform_indices = @transform_2, window_bounds = array<i64: 1, 128, 384>}, {pipeline_mode = #tpu.pipeline_mode<synchronous>, transform_indices = @transform_3, window_bounds = array<i64: 1, 1, 128>}, {transform_indices = @transform_4, window_bounds = array<i64: 1, 8, 128>}]} {
    %c0_i32 = arith.constant 0 : i32
    %0 = arith.cmpi eq, %arg1, %c0_i32 : i32
    %1 = arith.extui %0 : i1 to i32
    %c0_i32_0 = arith.constant 0 : i32
    %2 = arith.cmpi ne, %1, %c0_i32_0 : i32
    scf.if %2 {
      %cst_61 = arith.constant 0.000000e+00 : f32
      %209 = vector.broadcast %cst_61 : f32 to vector<8x128xf32>
      %c0_62 = arith.constant 0 : index
      %c0_63 = arith.constant 0 : index
      %210 = vector.load %arg7[%c0_62, %c0_63] : memref<8x128xf32, #tpu.memory_space<vmem>>, vector<8x128xf32>
      tpu.vector_store %arg7[%c0_62, %c0_63], %209 {strides = array<i32>} : memref<8x128xf32, #tpu.memory_space<vmem>>, vector<8x128xf32>,
    } else {
    }
    %c0 = arith.constant 0 : index
    %c0_1 = arith.constant 0 : index
    %3 = vector.load %arg3[%c0, %c0_1] : memref<8x1xi32, #tpu.memory_space<vmem>>, vector<8x1xi32>
    %c0_2 = arith.constant 0 : index
    %c0_3 = arith.constant 0 : index
    %c0_4 = arith.constant 0 : index
    %4 = vector.load %arg4[%c0_2, %c0_3, %c0_4] : memref<1x128x384xf32, #tpu.memory_space<vmem>>, vector<1x128x384xf32>
    %5 = vector.shape_cast %4 : vector<1x128x384xf32> to vector<128x384xf32>
    %c0_5 = arith.constant 0 : index
    %c0_6 = arith.constant 0 : index
    %c0_7 = arith.constant 0 : index
    %6 = vector.load %arg5[%c0_5, %c0_6, %c0_7] : memref<1x1x128xf32, #tpu.memory_space<vmem>>, vector<1x1x128xf32>
    %7 = vector.shape_cast %6 : vector<1x1x128xf32> to vector<1x128xf32>
    %c0_8 = arith.constant 0 : index
    %c0_9 = arith.constant 0 : index
    %8 = vector.load %arg7[%c0_8, %c0_9] : memref<8x128xf32, #tpu.memory_space<vmem>>, vector<8x128xf32>
    %c0_i32_10 = arith.constant 0 : i32
    %c4_i32 = arith.constant 4 : i32
    %9 = arith.muli %arg1, %c4_i32 : i32
    %10 = arith.addi %9, %c0_i32_10 : i32
    %c1_i32 = arith.constant 1 : i32
    %11 = arith.subi %c1_i32, %arg0 : i32
    %12 = arith.muli %11, %c0_i32_10 : i32
    %c3_i32 = arith.constant 3 : i32
    %13 = arith.subi %c3_i32, %c0_i32_10 : i32
    %14 = arith.muli %arg0, %13 : i32
    %15 = arith.addi %12, %14 : i32
    %c1_i32_11 = arith.constant 1 : i32
    %16 = arith.subi %c1_i32_11, %arg0 : i32
    %17 = arith.muli %16, %10 : i32
    %c7_i32 = arith.constant 7 : i32
    %18 = arith.subi %c7_i32, %10 : i32
    %19 = arith.muli %arg0, %18 : i32
    %20 = arith.addi %17, %19 : i32
    %c0_12 = arith.constant 0 : index
    %21 = arith.index_cast %15 : i32 to index
    %c0_13 = arith.constant 0 : index
    %c0_14 = arith.constant 0 : index
    %22 = vector.load %arg2[%c0_12, %21, %c0_13, %c0_14] : memref<1x4x8x384xf32, #tpu.memory_space<vmem>>, vector<1x1x8x384xf32>
    %23 = vector.shape_cast %22 : vector<1x1x8x384xf32> to vector<8x384xf32>
    %cst = arith.constant dense<0.000000e+00> : vector<8x384xf32>
    %24 = tpu.matmul %8, %5, %cst {dimension_numbers = #tpu.dot_dimension_numbers<[1], [0], [0], [1], [0, 0, 1, 1], [], []>} : vector<8x128xf32>, vector<128x384xf32>, vector<8x384xf32> -> vector<8x384xf32>
    %25 = vector.extract_strided_slice %23 {offsets = [0, 0], sizes = [8, 128], strides = [1, 1]} : vector<8x384xf32> to vector<8x128xf32>
    %26 = vector.extract_strided_slice %24 {offsets = [0, 0], sizes = [8, 128], strides = [1, 1]} : vector<8x384xf32> to vector<8x128xf32>
    %27 = arith.addf %25, %26 : vector<8x128xf32>
    %28 = arith.negf %27 : vector<8x128xf32>
    %29 = math.exp %28 : vector<8x128xf32>
    %cst_15 = arith.constant 1.000000e+00 : f32
    %30 = vector.broadcast %cst_15 : f32 to vector<8x128xf32>
    %31 = arith.addf %30, %29 : vector<8x128xf32>
    %32 = arith.divf %30, %31 : vector<8x128xf32>
    %33 = vector.extract_strided_slice %23 {offsets = [0, 128], sizes = [8, 128], strides = [1, 1]} : vector<8x384xf32> to vector<8x128xf32>
    %34 = vector.extract_strided_slice %24 {offsets = [0, 128], sizes = [8, 128], strides = [1, 1]} : vector<8x384xf32> to vector<8x128xf32>
    %35 = arith.addf %33, %34 : vector<8x128xf32>
    %36 = arith.negf %35 : vector<8x128xf32>
    %37 = math.exp %36 : vector<8x128xf32>
    %cst_16 = arith.constant 1.000000e+00 : f32
    %38 = vector.broadcast %cst_16 : f32 to vector<8x128xf32>
    %39 = arith.addf %38, %37 : vector<8x128xf32>
    %40 = arith.divf %38, %39 : vector<8x128xf32>
    %41 = vector.extract_strided_slice %23 {offsets = [0, 256], sizes = [8, 128], strides = [1, 1]} : vector<8x384xf32> to vector<8x128xf32>
    %42 = vector.extract_strided_slice %24 {offsets = [0, 256], sizes = [8, 128], strides = [1, 1]} : vector<8x384xf32> to vector<8x128xf32>
    %43 = vector.broadcast %7 : vector<1x128xf32> to vector<8x128xf32>
    %44 = arith.addf %42, %43 : vector<8x128xf32>
    %45 = arith.mulf %32, %44 : vector<8x128xf32>
    %46 = arith.addf %41, %45 : vector<8x128xf32>
    %47 = math.tanh %46 : vector<8x128xf32>
    %cst_17 = arith.constant 1.000000e+00 : f32
    %48 = vector.broadcast %cst_17 : f32 to vector<8x128xf32>
    %49 = arith.subf %48, %40 : vector<8x128xf32>
    %50 = arith.mulf %49, %47 : vector<8x128xf32>
    %51 = arith.mulf %40, %8 : vector<8x128xf32>
    %52 = arith.addf %50, %51 : vector<8x128xf32>
    %53 = vector.broadcast %20 : i32 to vector<8x1xi32>
    %54 = arith.cmpi slt, %53, %3 : vector<8x1xi32>
    %55 = vector.shape_cast %54 : vector<8x1xi1> to vector<8x1xi1>
    %56 = vector.broadcast %55 : vector<8x1xi1> to vector<8x128xi1>
    %57 = arith.select %56, %52, %8 : vector<8x128xi1>, vector<8x128xf32>
    %c1_i32_18 = arith.constant 1 : i32
    %c4_i32_19 = arith.constant 4 : i32
    %58 = arith.muli %arg1, %c4_i32_19 : i32
    %59 = arith.addi %58, %c1_i32_18 : i32
    %c1_i32_20 = arith.constant 1 : i32
    %60 = arith.subi %c1_i32_20, %arg0 : i32
    %61 = arith.muli %60, %c1_i32_18 : i32
    %c3_i32_21 = arith.constant 3 : i32
    %62 = arith.subi %c3_i32_21, %c1_i32_18 : i32
    %63 = arith.muli %arg0, %62 : i32
    %64 = arith.addi %61, %63 : i32
    %c1_i32_22 = arith.constant 1 : i32
    %65 = arith.subi %c1_i32_22, %arg0 : i32
    %66 = arith.muli %65, %59 : i32
    %c7_i32_23 = arith.constant 7 : i32
    %67 = arith.subi %c7_i32_23, %59 : i32
    %68 = arith.muli %arg0, %67 : i32
    %69 = arith.addi %66, %68 : i32
    %c0_24 = arith.constant 0 : index
    %70 = arith.index_cast %64 : i32 to index
    %c0_25 = arith.constant 0 : index
    %c0_26 = arith.constant 0 : index
    %71 = vector.load %arg2[%c0_24, %70, %c0_25, %c0_26] : memref<1x4x8x384xf32, #tpu.memory_space<vmem>>, vector<1x1x8x384xf32>
    %72 = vector.shape_cast %71 : vector<1x1x8x384xf32> to vector<8x384xf32>
    %cst_27 = arith.constant dense<0.000000e+00> : vector<8x384xf32>
    %73 = tpu.matmul %57, %5, %cst_27 {dimension_numbers = #tpu.dot_dimension_numbers<[1], [0], [0], [1], [0, 0, 1, 1], [], []>} : vector<8x128xf32>, vector<128x384xf32>, vector<8x384xf32> -> vector<8x384xf32>
    %74 = vector.extract_strided_slice %72 {offsets = [0, 0], sizes = [8, 128], strides = [1, 1]} : vector<8x384xf32> to vector<8x128xf32>
    %75 = vector.extract_strided_slice %73 {offsets = [0, 0], sizes = [8, 128], strides = [1, 1]} : vector<8x384xf32> to vector<8x128xf32>
    %76 = arith.addf %74, %75 : vector<8x128xf32>
    %77 = arith.negf %76 : vector<8x128xf32>
    %78 = math.exp %77 : vector<8x128xf32>
    %cst_28 = arith.constant 1.000000e+00 : f32
    %79 = vector.broadcast %cst_28 : f32 to vector<8x128xf32>
    %80 = arith.addf %79, %78 : vector<8x128xf32>
    %81 = arith.divf %79, %80 : vector<8x128xf32>
    %82 = vector.extract_strided_slice %72 {offsets = [0, 128], sizes = [8, 128], strides = [1, 1]} : vector<8x384xf32> to vector<8x128xf32>
    %83 = vector.extract_strided_slice %73 {offsets = [0, 128], sizes = [8, 128], strides = [1, 1]} : vector<8x384xf32> to vector<8x128xf32>
    %84 = arith.addf %82, %83 : vector<8x128xf32>
    %85 = arith.negf %84 : vector<8x128xf32>
    %86 = math.exp %85 : vector<8x128xf32>
    %cst_29 = arith.constant 1.000000e+00 : f32
    %87 = vector.broadcast %cst_29 : f32 to vector<8x128xf32>
    %88 = arith.addf %87, %86 : vector<8x128xf32>
    %89 = arith.divf %87, %88 : vector<8x128xf32>
    %90 = vector.extract_strided_slice %72 {offsets = [0, 256], sizes = [8, 128], strides = [1, 1]} : vector<8x384xf32> to vector<8x128xf32>
    %91 = vector.extract_strided_slice %73 {offsets = [0, 256], sizes = [8, 128], strides = [1, 1]} : vector<8x384xf32> to vector<8x128xf32>
    %92 = vector.broadcast %7 : vector<1x128xf32> to vector<8x128xf32>
    %93 = arith.addf %91, %92 : vector<8x128xf32>
    %94 = arith.mulf %81, %93 : vector<8x128xf32>
    %95 = arith.addf %90, %94 : vector<8x128xf32>
    %96 = math.tanh %95 : vector<8x128xf32>
    %cst_30 = arith.constant 1.000000e+00 : f32
    %97 = vector.broadcast %cst_30 : f32 to vector<8x128xf32>
    %98 = arith.subf %97, %89 : vector<8x128xf32>
    %99 = arith.mulf %98, %96 : vector<8x128xf32>
    %100 = arith.mulf %89, %57 : vector<8x128xf32>
    %101 = arith.addf %99, %100 : vector<8x128xf32>
    %102 = vector.broadcast %69 : i32 to vector<8x1xi32>
    %103 = arith.cmpi slt, %102, %3 : vector<8x1xi32>
    %104 = vector.shape_cast %103 : vector<8x1xi1> to vector<8x1xi1>
    %105 = vector.broadcast %104 : vector<8x1xi1> to vector<8x128xi1>
    %106 = arith.select %105, %101, %57 : vector<8x128xi1>, vector<8x128xf32>
    %c2_i32 = arith.constant 2 : i32
    %c4_i32_31 = arith.constant 4 : i32
    %107 = arith.muli %arg1, %c4_i32_31 : i32
    %108 = arith.addi %107, %c2_i32 : i32
    %c1_i32_32 = arith.constant 1 : i32
    %109 = arith.subi %c1_i32_32, %arg0 : i32
    %110 = arith.muli %109, %c2_i32 : i32
    %c3_i32_33 = arith.constant 3 : i32
    %111 = arith.subi %c3_i32_33, %c2_i32 : i32
    %112 = arith.muli %arg0, %111 : i32
    %113 = arith.addi %110, %112 : i32
    %c1_i32_34 = arith.constant 1 : i32
    %114 = arith.subi %c1_i32_34, %arg0 : i32
    %115 = arith.muli %114, %108 : i32
    %c7_i32_35 = arith.constant 7 : i32
    %116 = arith.subi %c7_i32_35, %108 : i32
    %117 = arith.muli %arg0, %116 : i32
    %118 = arith.addi %115, %117 : i32
    %c0_36 = arith.constant 0 : index
    %119 = arith.index_cast %113 : i32 to index
    %c0_37 = arith.constant 0 : index
    %c0_38 = arith.constant 0 : index
    %120 = vector.load %arg2[%c0_36, %119, %c0_37, %c0_38] : memref<1x4x8x384xf32, #tpu.memory_space<vmem>>, vector<1x1x8x384xf32>
    %121 = vector.shape_cast %120 : vector<1x1x8x384xf32> to vector<8x384xf32>
    %cst_39 = arith.constant dense<0.000000e+00> : vector<8x384xf32>
    %122 = tpu.matmul %106, %5, %cst_39 {dimension_numbers = #tpu.dot_dimension_numbers<[1], [0], [0], [1], [0, 0, 1, 1], [], []>} : vector<8x128xf32>, vector<128x384xf32>, vector<8x384xf32> -> vector<8x384xf32>
    %123 = vector.extract_strided_slice %121 {offsets = [0, 0], sizes = [8, 128], strides = [1, 1]} : vector<8x384xf32> to vector<8x128xf32>
    %124 = vector.extract_strided_slice %122 {offsets = [0, 0], sizes = [8, 128], strides = [1, 1]} : vector<8x384xf32> to vector<8x128xf32>
    %125 = arith.addf %123, %124 : vector<8x128xf32>
    %126 = arith.negf %125 : vector<8x128xf32>
    %127 = math.exp %126 : vector<8x128xf32>
    %cst_40 = arith.constant 1.000000e+00 : f32
    %128 = vector.broadcast %cst_40 : f32 to vector<8x128xf32>
    %129 = arith.addf %128, %127 : vector<8x128xf32>
    %130 = arith.divf %128, %129 : vector<8x128xf32>
    %131 = vector.extract_strided_slice %121 {offsets = [0, 128], sizes = [8, 128], strides = [1, 1]} : vector<8x384xf32> to vector<8x128xf32>
    %132 = vector.extract_strided_slice %122 {offsets = [0, 128], sizes = [8, 128], strides = [1, 1]} : vector<8x384xf32> to vector<8x128xf32>
    %133 = arith.addf %131, %132 : vector<8x128xf32>
    %134 = arith.negf %133 : vector<8x128xf32>
    %135 = math.exp %134 : vector<8x128xf32>
    %cst_41 = arith.constant 1.000000e+00 : f32
    %136 = vector.broadcast %cst_41 : f32 to vector<8x128xf32>
    %137 = arith.addf %136, %135 : vector<8x128xf32>
    %138 = arith.divf %136, %137 : vector<8x128xf32>
    %139 = vector.extract_strided_slice %121 {offsets = [0, 256], sizes = [8, 128], strides = [1, 1]} : vector<8x384xf32> to vector<8x128xf32>
    %140 = vector.extract_strided_slice %122 {offsets = [0, 256], sizes = [8, 128], strides = [1, 1]} : vector<8x384xf32> to vector<8x128xf32>
    %141 = vector.broadcast %7 : vector<1x128xf32> to vector<8x128xf32>
    %142 = arith.addf %140, %141 : vector<8x128xf32>
    %143 = arith.mulf %130, %142 : vector<8x128xf32>
    %144 = arith.addf %139, %143 : vector<8x128xf32>
    %145 = math.tanh %144 : vector<8x128xf32>
    %cst_42 = arith.constant 1.000000e+00 : f32
    %146 = vector.broadcast %cst_42 : f32 to vector<8x128xf32>
    %147 = arith.subf %146, %138 : vector<8x128xf32>
    %148 = arith.mulf %147, %145 : vector<8x128xf32>
    %149 = arith.mulf %138, %106 : vector<8x128xf32>
    %150 = arith.addf %148, %149 : vector<8x128xf32>
    %151 = vector.broadcast %118 : i32 to vector<8x1xi32>
    %152 = arith.cmpi slt, %151, %3 : vector<8x1xi32>
    %153 = vector.shape_cast %152 : vector<8x1xi1> to vector<8x1xi1>
    %154 = vector.broadcast %153 : vector<8x1xi1> to vector<8x128xi1>
    %155 = arith.select %154, %150, %106 : vector<8x128xi1>, vector<8x128xf32>
    %c3_i32_43 = arith.constant 3 : i32
    %c4_i32_44 = arith.constant 4 : i32
    %156 = arith.muli %arg1, %c4_i32_44 : i32
    %157 = arith.addi %156, %c3_i32_43 : i32
    %c1_i32_45 = arith.constant 1 : i32
    %158 = arith.subi %c1_i32_45, %arg0 : i32
    %159 = arith.muli %158, %c3_i32_43 : i32
    %c3_i32_46 = arith.constant 3 : i32
    %160 = arith.subi %c3_i32_46, %c3_i32_43 : i32
    %161 = arith.muli %arg0, %160 : i32
    %162 = arith.addi %159, %161 : i32
    %c1_i32_47 = arith.constant 1 : i32
    %163 = arith.subi %c1_i32_47, %arg0 : i32
    %164 = arith.muli %163, %157 : i32
    %c7_i32_48 = arith.constant 7 : i32
    %165 = arith.subi %c7_i32_48, %157 : i32
    %166 = arith.muli %arg0, %165 : i32
    %167 = arith.addi %164, %166 : i32
    %c0_49 = arith.constant 0 : index
    %168 = arith.index_cast %162 : i32 to index
    %c0_50 = arith.constant 0 : index
    %c0_51 = arith.constant 0 : index
    %169 = vector.load %arg2[%c0_49, %168, %c0_50, %c0_51] : memref<1x4x8x384xf32, #tpu.memory_space<vmem>>, vector<1x1x8x384xf32>
    %170 = vector.shape_cast %169 : vector<1x1x8x384xf32> to vector<8x384xf32>
    %cst_52 = arith.constant dense<0.000000e+00> : vector<8x384xf32>
    %171 = tpu.matmul %155, %5, %cst_52 {dimension_numbers = #tpu.dot_dimension_numbers<[1], [0], [0], [1], [0, 0, 1, 1], [], []>} : vector<8x128xf32>, vector<128x384xf32>, vector<8x384xf32> -> vector<8x384xf32>
    %172 = vector.extract_strided_slice %170 {offsets = [0, 0], sizes = [8, 128], strides = [1, 1]} : vector<8x384xf32> to vector<8x128xf32>
    %173 = vector.extract_strided_slice %171 {offsets = [0, 0], sizes = [8, 128], strides = [1, 1]} : vector<8x384xf32> to vector<8x128xf32>
    %174 = arith.addf %172, %173 : vector<8x128xf32>
    %175 = arith.negf %174 : vector<8x128xf32>
    %176 = math.exp %175 : vector<8x128xf32>
    %cst_53 = arith.constant 1.000000e+00 : f32
    %177 = vector.broadcast %cst_53 : f32 to vector<8x128xf32>
    %178 = arith.addf %177, %176 : vector<8x128xf32>
    %179 = arith.divf %177, %178 : vector<8x128xf32>
    %180 = vector.extract_strided_slice %170 {offsets = [0, 128], sizes = [8, 128], strides = [1, 1]} : vector<8x384xf32> to vector<8x128xf32>
    %181 = vector.extract_strided_slice %171 {offsets = [0, 128], sizes = [8, 128], strides = [1, 1]} : vector<8x384xf32> to vector<8x128xf32>
    %182 = arith.addf %180, %181 : vector<8x128xf32>
    %183 = arith.negf %182 : vector<8x128xf32>
    %184 = math.exp %183 : vector<8x128xf32>
    %cst_54 = arith.constant 1.000000e+00 : f32
    %185 = vector.broadcast %cst_54 : f32 to vector<8x128xf32>
    %186 = arith.addf %185, %184 : vector<8x128xf32>
    %187 = arith.divf %185, %186 : vector<8x128xf32>
    %188 = vector.extract_strided_slice %170 {offsets = [0, 256], sizes = [8, 128], strides = [1, 1]} : vector<8x384xf32> to vector<8x128xf32>
    %189 = vector.extract_strided_slice %171 {offsets = [0, 256], sizes = [8, 128], strides = [1, 1]} : vector<8x384xf32> to vector<8x128xf32>
    %190 = vector.broadcast %7 : vector<1x128xf32> to vector<8x128xf32>
    %191 = arith.addf %189, %190 : vector<8x128xf32>
    %192 = arith.mulf %179, %191 : vector<8x128xf32>
    %193 = arith.addf %188, %192 : vector<8x128xf32>
    %194 = math.tanh %193 : vector<8x128xf32>
    %cst_55 = arith.constant 1.000000e+00 : f32
    %195 = vector.broadcast %cst_55 : f32 to vector<8x128xf32>
    %196 = arith.subf %195, %187 : vector<8x128xf32>
    %197 = arith.mulf %196, %194 : vector<8x128xf32>
    %198 = arith.mulf %187, %155 : vector<8x128xf32>
    %199 = arith.addf %197, %198 : vector<8x128xf32>
    %200 = vector.broadcast %167 : i32 to vector<8x1xi32>
    %201 = arith.cmpi slt, %200, %3 : vector<8x1xi32>
    %202 = vector.shape_cast %201 : vector<8x1xi1> to vector<8x1xi1>
    %203 = vector.broadcast %202 : vector<8x1xi1> to vector<8x128xi1>
    %204 = arith.select %203, %199, %155 : vector<8x128xi1>, vector<8x128xf32>
    %c4_i32_56 = arith.constant 4 : i32
    %c0_57 = arith.constant 0 : index
    %c0_58 = arith.constant 0 : index
    %205 = vector.load %arg7[%c0_57, %c0_58] : memref<8x128xf32, #tpu.memory_space<vmem>>, vector<8x128xf32>
    tpu.vector_store %arg7[%c0_57, %c0_58], %204 {strides = array<i32>} : memref<8x128xf32, #tpu.memory_space<vmem>>, vector<8x128xf32>,
    %c1_i32_59 = arith.constant 1 : i32
    %206 = arith.cmpi eq, %arg1, %c1_i32_59 : i32
    %207 = arith.extui %206 : i1 to i32
    %c0_i32_60 = arith.constant 0 : i32
    %208 = arith.cmpi ne, %207, %c0_i32_60 : i32
    scf.if %208 {
      %c0_61 = arith.constant 0 : index
      %c0_62 = arith.constant 0 : index
      %209 = vector.load %arg7[%c0_61, %c0_62] : memref<8x128xf32, #tpu.memory_space<vmem>>, vector<8x128xf32>
      %c0_63 = arith.constant 0 : index
      %c0_64 = arith.constant 0 : index
      %c0_65 = arith.constant 0 : index
      %210 = vector.load %arg6[%c0_63, %c0_64, %c0_65] : memref<1x8x128xf32, #tpu.memory_space<vmem>>, vector<1x8x128xf32>
      %211 = vector.shape_cast %210 : vector<1x8x128xf32> to vector<8x128xf32>
      %212 = vector.shape_cast %209 : vector<8x128xf32> to vector<1x8x128xf32>
      tpu.vector_store %arg6[%c0_63, %c0_64, %c0_65], %212 {strides = array<i32>} : memref<1x8x128xf32, #tpu.memory_space<vmem>>, vector<1x8x128xf32>,
    } else {
    }
    return
  }
  func.func @transform_0(%arg0: i32, %arg1: i32) -> (i32, i32, i32, i32) {
    %c2_i32 = arith.constant 2 : i32
    %0 = arith.muli %c2_i32, %arg1 : i32
    %c1_i32 = arith.constant 1 : i32
    %1 = arith.subi %c1_i32, %0 : i32
    %2 = arith.muli %arg0, %1 : i32
    %3 = arith.addi %arg1, %2 : i32
    %c0_i32 = arith.constant 0 : i32
    %c0_i32_0 = arith.constant 0 : i32
    %c0_i32_1 = arith.constant 0 : i32
    return %arg0, %3, %c0_i32, %c0_i32_0 : i32, i32, i32, i32
  }
  func.func @transform_1(%arg0: i32, %arg1: i32) -> (i32, i32) {
    %c0_i32 = arith.constant 0 : i32
    %c0_i32_0 = arith.constant 0 : i32
    %c0_i32_1 = arith.constant 0 : i32
    return %c0_i32, %c0_i32_0 : i32, i32
  }
  func.func @transform_2(%arg0: i32, %arg1: i32) -> (i32, i32, i32) {
    %c0_i32 = arith.constant 0 : i32
    %c0_i32_0 = arith.constant 0 : i32
    %c0_i32_1 = arith.constant 0 : i32
    return %arg0, %c0_i32, %c0_i32_0 : i32, i32, i32
  }
  func.func @transform_3(%arg0: i32, %arg1: i32) -> (i32, i32, i32) {
    %c0_i32 = arith.constant 0 : i32
    %c0_i32_0 = arith.constant 0 : i32
    %c0_i32_1 = arith.constant 0 : i32
    return %arg0, %c0_i32, %c0_i32_0 : i32, i32, i32
  }
  func.func @transform_4(%arg0: i32, %arg1: i32) -> (i32, i32, i32) {
    %c0_i32 = arith.constant 0 : i32
    %c0_i32_0 = arith.constant 0 : i32
    %c0_i32_1 = arith.constant 0 : i32
    return %arg0, %c0_i32, %c0_i32_0 : i32, i32, i32
  }
}

module attributes {stable_mosaic.version = 11 : i64} {
  func.func @gru_recurrence_kernel(%arg0: i32, %arg1: i32, %arg2: memref<1x4x8x384xf32, #tpu.memory_space<vmem>>, %arg3: memref<8x1xi32, #tpu.memory_space<vmem>>, %arg4: memref<1x128x384xf32, #tpu.memory_space<vmem>>, %arg5: memref<1x1x128xf32, #tpu.memory_space<vmem>>, %arg6: memref<1x8x128xf32, #tpu.memory_space<vmem>>, %arg7: memref<8x128xf32, #tpu.memory_space<vmem>>) attributes {dimension_semantics = [#tpu.dimension_semantics<parallel>, #tpu.dimension_semantics<arbitrary>], iteration_bounds = array<i64: 2, 2>, scalar_prefetch = 0 : i64, scratch_operands = 1 : i64, tpu.core_type = #tpu.core_type<tc>, window_params = [{transform_indices = @transform_0, window_bounds = array<i64: 1, 4, 8, 384>}, {pipeline_mode = #tpu.pipeline_mode<synchronous>, transform_indices = @transform_1, window_bounds = array<i64: 8, 1>}, {transform_indices = @transform_2, window_bounds = array<i64: 1, 128, 384>}, {transform_indices = @transform_3, window_bounds = array<i64: 1, 1, 128>}, {transform_indices = @transform_4, window_bounds = array<i64: 1, 8, 128>}]} {
    %c0_i32 = arith.constant 0 : i32
    %0 = arith.cmpi eq, %arg1, %c0_i32 : i32
    %1 = arith.extui %0 : i1 to i32
    %c0_i32_0 = arith.constant 0 : i32
    %2 = arith.cmpi ne, %1, %c0_i32_0 : i32
    scf.if %2 {
      %cst_61 = arith.constant 0.000000e+00 : f32
      %209 = vector.broadcast %cst_61 : f32 to vector<8x128xf32>
      %c0_62 = arith.constant 0 : index
      %c0_63 = arith.constant 0 : index
      %210 = vector.load %arg7[%c0_62, %c0_63] : memref<8x128xf32, #tpu.memory_space<vmem>>, vector<8x128xf32>
      tpu.vector_store %arg7[%c0_62, %c0_63], %209 {strides = array<i32>} : memref<8x128xf32, #tpu.memory_space<vmem>>, vector<8x128xf32>,
    } else {
    }
    %c0 = arith.constant 0 : index
    %c0_1 = arith.constant 0 : index
    %3 = vector.load %arg3[%c0, %c0_1] : memref<8x1xi32, #tpu.memory_space<vmem>>, vector<8x1xi32>
    %c0_2 = arith.constant 0 : index
    %c0_3 = arith.constant 0 : index
    %c0_4 = arith.constant 0 : index
    %4 = vector.load %arg4[%c0_2, %c0_3, %c0_4] : memref<1x128x384xf32, #tpu.memory_space<vmem>>, vector<1x128x384xf32>
    %5 = vector.shape_cast %4 : vector<1x128x384xf32> to vector<128x384xf32>
    %c0_5 = arith.constant 0 : index
    %c0_6 = arith.constant 0 : index
    %c0_7 = arith.constant 0 : index
    %6 = vector.load %arg5[%c0_5, %c0_6, %c0_7] : memref<1x1x128xf32, #tpu.memory_space<vmem>>, vector<1x1x128xf32>
    %7 = vector.shape_cast %6 : vector<1x1x128xf32> to vector<1x128xf32>
    %c0_8 = arith.constant 0 : index
    %c0_9 = arith.constant 0 : index
    %8 = vector.load %arg7[%c0_8, %c0_9] : memref<8x128xf32, #tpu.memory_space<vmem>>, vector<8x128xf32>
    %c0_i32_10 = arith.constant 0 : i32
    %c4_i32 = arith.constant 4 : i32
    %9 = arith.muli %arg1, %c4_i32 : i32
    %10 = arith.addi %9, %c0_i32_10 : i32
    %c1_i32 = arith.constant 1 : i32
    %11 = arith.subi %c1_i32, %arg0 : i32
    %12 = arith.muli %11, %c0_i32_10 : i32
    %c3_i32 = arith.constant 3 : i32
    %13 = arith.subi %c3_i32, %c0_i32_10 : i32
    %14 = arith.muli %arg0, %13 : i32
    %15 = arith.addi %12, %14 : i32
    %c1_i32_11 = arith.constant 1 : i32
    %16 = arith.subi %c1_i32_11, %arg0 : i32
    %17 = arith.muli %16, %10 : i32
    %c7_i32 = arith.constant 7 : i32
    %18 = arith.subi %c7_i32, %10 : i32
    %19 = arith.muli %arg0, %18 : i32
    %20 = arith.addi %17, %19 : i32
    %c0_12 = arith.constant 0 : index
    %21 = arith.index_cast %15 : i32 to index
    %c0_13 = arith.constant 0 : index
    %c0_14 = arith.constant 0 : index
    %22 = vector.load %arg2[%c0_12, %21, %c0_13, %c0_14] : memref<1x4x8x384xf32, #tpu.memory_space<vmem>>, vector<1x1x8x384xf32>
    %23 = vector.shape_cast %22 : vector<1x1x8x384xf32> to vector<8x384xf32>
    %cst = arith.constant dense<0.000000e+00> : vector<8x384xf32>
    %24 = tpu.matmul %8, %5, %cst {dimension_numbers = #tpu.dot_dimension_numbers<[1], [0], [0], [1], [0, 0, 1, 1], [], []>} : vector<8x128xf32>, vector<128x384xf32>, vector<8x384xf32> -> vector<8x384xf32>
    %25 = vector.extract_strided_slice %23 {offsets = [0, 0], sizes = [8, 128], strides = [1, 1]} : vector<8x384xf32> to vector<8x128xf32>
    %26 = vector.extract_strided_slice %24 {offsets = [0, 0], sizes = [8, 128], strides = [1, 1]} : vector<8x384xf32> to vector<8x128xf32>
    %27 = arith.addf %25, %26 : vector<8x128xf32>
    %28 = arith.negf %27 : vector<8x128xf32>
    %29 = math.exp %28 : vector<8x128xf32>
    %cst_15 = arith.constant 1.000000e+00 : f32
    %30 = vector.broadcast %cst_15 : f32 to vector<8x128xf32>
    %31 = arith.addf %30, %29 : vector<8x128xf32>
    %32 = arith.divf %30, %31 : vector<8x128xf32>
    %33 = vector.extract_strided_slice %23 {offsets = [0, 128], sizes = [8, 128], strides = [1, 1]} : vector<8x384xf32> to vector<8x128xf32>
    %34 = vector.extract_strided_slice %24 {offsets = [0, 128], sizes = [8, 128], strides = [1, 1]} : vector<8x384xf32> to vector<8x128xf32>
    %35 = arith.addf %33, %34 : vector<8x128xf32>
    %36 = arith.negf %35 : vector<8x128xf32>
    %37 = math.exp %36 : vector<8x128xf32>
    %cst_16 = arith.constant 1.000000e+00 : f32
    %38 = vector.broadcast %cst_16 : f32 to vector<8x128xf32>
    %39 = arith.addf %38, %37 : vector<8x128xf32>
    %40 = arith.divf %38, %39 : vector<8x128xf32>
    %41 = vector.extract_strided_slice %23 {offsets = [0, 256], sizes = [8, 128], strides = [1, 1]} : vector<8x384xf32> to vector<8x128xf32>
    %42 = vector.extract_strided_slice %24 {offsets = [0, 256], sizes = [8, 128], strides = [1, 1]} : vector<8x384xf32> to vector<8x128xf32>
    %43 = vector.broadcast %7 : vector<1x128xf32> to vector<8x128xf32>
    %44 = arith.addf %42, %43 : vector<8x128xf32>
    %45 = arith.mulf %32, %44 : vector<8x128xf32>
    %46 = arith.addf %41, %45 : vector<8x128xf32>
    %47 = math.tanh %46 : vector<8x128xf32>
    %cst_17 = arith.constant 1.000000e+00 : f32
    %48 = vector.broadcast %cst_17 : f32 to vector<8x128xf32>
    %49 = arith.subf %48, %40 : vector<8x128xf32>
    %50 = arith.mulf %49, %47 : vector<8x128xf32>
    %51 = arith.mulf %40, %8 : vector<8x128xf32>
    %52 = arith.addf %50, %51 : vector<8x128xf32>
    %53 = vector.broadcast %20 : i32 to vector<8x1xi32>
    %54 = arith.cmpi slt, %53, %3 : vector<8x1xi32>
    %55 = vector.shape_cast %54 : vector<8x1xi1> to vector<8x1xi1>
    %56 = vector.broadcast %55 : vector<8x1xi1> to vector<8x128xi1>
    %57 = arith.select %56, %52, %8 : vector<8x128xi1>, vector<8x128xf32>
    %c1_i32_18 = arith.constant 1 : i32
    %c4_i32_19 = arith.constant 4 : i32
    %58 = arith.muli %arg1, %c4_i32_19 : i32
    %59 = arith.addi %58, %c1_i32_18 : i32
    %c1_i32_20 = arith.constant 1 : i32
    %60 = arith.subi %c1_i32_20, %arg0 : i32
    %61 = arith.muli %60, %c1_i32_18 : i32
    %c3_i32_21 = arith.constant 3 : i32
    %62 = arith.subi %c3_i32_21, %c1_i32_18 : i32
    %63 = arith.muli %arg0, %62 : i32
    %64 = arith.addi %61, %63 : i32
    %c1_i32_22 = arith.constant 1 : i32
    %65 = arith.subi %c1_i32_22, %arg0 : i32
    %66 = arith.muli %65, %59 : i32
    %c7_i32_23 = arith.constant 7 : i32
    %67 = arith.subi %c7_i32_23, %59 : i32
    %68 = arith.muli %arg0, %67 : i32
    %69 = arith.addi %66, %68 : i32
    %c0_24 = arith.constant 0 : index
    %70 = arith.index_cast %64 : i32 to index
    %c0_25 = arith.constant 0 : index
    %c0_26 = arith.constant 0 : index
    %71 = vector.load %arg2[%c0_24, %70, %c0_25, %c0_26] : memref<1x4x8x384xf32, #tpu.memory_space<vmem>>, vector<1x1x8x384xf32>
    %72 = vector.shape_cast %71 : vector<1x1x8x384xf32> to vector<8x384xf32>
    %cst_27 = arith.constant dense<0.000000e+00> : vector<8x384xf32>
    %73 = tpu.matmul %57, %5, %cst_27 {dimension_numbers = #tpu.dot_dimension_numbers<[1], [0], [0], [1], [0, 0, 1, 1], [], []>} : vector<8x128xf32>, vector<128x384xf32>, vector<8x384xf32> -> vector<8x384xf32>
    %74 = vector.extract_strided_slice %72 {offsets = [0, 0], sizes = [8, 128], strides = [1, 1]} : vector<8x384xf32> to vector<8x128xf32>
    %75 = vector.extract_strided_slice %73 {offsets = [0, 0], sizes = [8, 128], strides = [1, 1]} : vector<8x384xf32> to vector<8x128xf32>
    %76 = arith.addf %74, %75 : vector<8x128xf32>
    %77 = arith.negf %76 : vector<8x128xf32>
    %78 = math.exp %77 : vector<8x128xf32>
    %cst_28 = arith.constant 1.000000e+00 : f32
    %79 = vector.broadcast %cst_28 : f32 to vector<8x128xf32>
    %80 = arith.addf %79, %78 : vector<8x128xf32>
    %81 = arith.divf %79, %80 : vector<8x128xf32>
    %82 = vector.extract_strided_slice %72 {offsets = [0, 128], sizes = [8, 128], strides = [1, 1]} : vector<8x384xf32> to vector<8x128xf32>
    %83 = vector.extract_strided_slice %73 {offsets = [0, 128], sizes = [8, 128], strides = [1, 1]} : vector<8x384xf32> to vector<8x128xf32>
    %84 = arith.addf %82, %83 : vector<8x128xf32>
    %85 = arith.negf %84 : vector<8x128xf32>
    %86 = math.exp %85 : vector<8x128xf32>
    %cst_29 = arith.constant 1.000000e+00 : f32
    %87 = vector.broadcast %cst_29 : f32 to vector<8x128xf32>
    %88 = arith.addf %87, %86 : vector<8x128xf32>
    %89 = arith.divf %87, %88 : vector<8x128xf32>
    %90 = vector.extract_strided_slice %72 {offsets = [0, 256], sizes = [8, 128], strides = [1, 1]} : vector<8x384xf32> to vector<8x128xf32>
    %91 = vector.extract_strided_slice %73 {offsets = [0, 256], sizes = [8, 128], strides = [1, 1]} : vector<8x384xf32> to vector<8x128xf32>
    %92 = vector.broadcast %7 : vector<1x128xf32> to vector<8x128xf32>
    %93 = arith.addf %91, %92 : vector<8x128xf32>
    %94 = arith.mulf %81, %93 : vector<8x128xf32>
    %95 = arith.addf %90, %94 : vector<8x128xf32>
    %96 = math.tanh %95 : vector<8x128xf32>
    %cst_30 = arith.constant 1.000000e+00 : f32
    %97 = vector.broadcast %cst_30 : f32 to vector<8x128xf32>
    %98 = arith.subf %97, %89 : vector<8x128xf32>
    %99 = arith.mulf %98, %96 : vector<8x128xf32>
    %100 = arith.mulf %89, %57 : vector<8x128xf32>
    %101 = arith.addf %99, %100 : vector<8x128xf32>
    %102 = vector.broadcast %69 : i32 to vector<8x1xi32>
    %103 = arith.cmpi slt, %102, %3 : vector<8x1xi32>
    %104 = vector.shape_cast %103 : vector<8x1xi1> to vector<8x1xi1>
    %105 = vector.broadcast %104 : vector<8x1xi1> to vector<8x128xi1>
    %106 = arith.select %105, %101, %57 : vector<8x128xi1>, vector<8x128xf32>
    %c2_i32 = arith.constant 2 : i32
    %c4_i32_31 = arith.constant 4 : i32
    %107 = arith.muli %arg1, %c4_i32_31 : i32
    %108 = arith.addi %107, %c2_i32 : i32
    %c1_i32_32 = arith.constant 1 : i32
    %109 = arith.subi %c1_i32_32, %arg0 : i32
    %110 = arith.muli %109, %c2_i32 : i32
    %c3_i32_33 = arith.constant 3 : i32
    %111 = arith.subi %c3_i32_33, %c2_i32 : i32
    %112 = arith.muli %arg0, %111 : i32
    %113 = arith.addi %110, %112 : i32
    %c1_i32_34 = arith.constant 1 : i32
    %114 = arith.subi %c1_i32_34, %arg0 : i32
    %115 = arith.muli %114, %108 : i32
    %c7_i32_35 = arith.constant 7 : i32
    %116 = arith.subi %c7_i32_35, %108 : i32
    %117 = arith.muli %arg0, %116 : i32
    %118 = arith.addi %115, %117 : i32
    %c0_36 = arith.constant 0 : index
    %119 = arith.index_cast %113 : i32 to index
    %c0_37 = arith.constant 0 : index
    %c0_38 = arith.constant 0 : index
    %120 = vector.load %arg2[%c0_36, %119, %c0_37, %c0_38] : memref<1x4x8x384xf32, #tpu.memory_space<vmem>>, vector<1x1x8x384xf32>
    %121 = vector.shape_cast %120 : vector<1x1x8x384xf32> to vector<8x384xf32>
    %cst_39 = arith.constant dense<0.000000e+00> : vector<8x384xf32>
    %122 = tpu.matmul %106, %5, %cst_39 {dimension_numbers = #tpu.dot_dimension_numbers<[1], [0], [0], [1], [0, 0, 1, 1], [], []>} : vector<8x128xf32>, vector<128x384xf32>, vector<8x384xf32> -> vector<8x384xf32>
    %123 = vector.extract_strided_slice %121 {offsets = [0, 0], sizes = [8, 128], strides = [1, 1]} : vector<8x384xf32> to vector<8x128xf32>
    %124 = vector.extract_strided_slice %122 {offsets = [0, 0], sizes = [8, 128], strides = [1, 1]} : vector<8x384xf32> to vector<8x128xf32>
    %125 = arith.addf %123, %124 : vector<8x128xf32>
    %126 = arith.negf %125 : vector<8x128xf32>
    %127 = math.exp %126 : vector<8x128xf32>
    %cst_40 = arith.constant 1.000000e+00 : f32
    %128 = vector.broadcast %cst_40 : f32 to vector<8x128xf32>
    %129 = arith.addf %128, %127 : vector<8x128xf32>
    %130 = arith.divf %128, %129 : vector<8x128xf32>
    %131 = vector.extract_strided_slice %121 {offsets = [0, 128], sizes = [8, 128], strides = [1, 1]} : vector<8x384xf32> to vector<8x128xf32>
    %132 = vector.extract_strided_slice %122 {offsets = [0, 128], sizes = [8, 128], strides = [1, 1]} : vector<8x384xf32> to vector<8x128xf32>
    %133 = arith.addf %131, %132 : vector<8x128xf32>
    %134 = arith.negf %133 : vector<8x128xf32>
    %135 = math.exp %134 : vector<8x128xf32>
    %cst_41 = arith.constant 1.000000e+00 : f32
    %136 = vector.broadcast %cst_41 : f32 to vector<8x128xf32>
    %137 = arith.addf %136, %135 : vector<8x128xf32>
    %138 = arith.divf %136, %137 : vector<8x128xf32>
    %139 = vector.extract_strided_slice %121 {offsets = [0, 256], sizes = [8, 128], strides = [1, 1]} : vector<8x384xf32> to vector<8x128xf32>
    %140 = vector.extract_strided_slice %122 {offsets = [0, 256], sizes = [8, 128], strides = [1, 1]} : vector<8x384xf32> to vector<8x128xf32>
    %141 = vector.broadcast %7 : vector<1x128xf32> to vector<8x128xf32>
    %142 = arith.addf %140, %141 : vector<8x128xf32>
    %143 = arith.mulf %130, %142 : vector<8x128xf32>
    %144 = arith.addf %139, %143 : vector<8x128xf32>
    %145 = math.tanh %144 : vector<8x128xf32>
    %cst_42 = arith.constant 1.000000e+00 : f32
    %146 = vector.broadcast %cst_42 : f32 to vector<8x128xf32>
    %147 = arith.subf %146, %138 : vector<8x128xf32>
    %148 = arith.mulf %147, %145 : vector<8x128xf32>
    %149 = arith.mulf %138, %106 : vector<8x128xf32>
    %150 = arith.addf %148, %149 : vector<8x128xf32>
    %151 = vector.broadcast %118 : i32 to vector<8x1xi32>
    %152 = arith.cmpi slt, %151, %3 : vector<8x1xi32>
    %153 = vector.shape_cast %152 : vector<8x1xi1> to vector<8x1xi1>
    %154 = vector.broadcast %153 : vector<8x1xi1> to vector<8x128xi1>
    %155 = arith.select %154, %150, %106 : vector<8x128xi1>, vector<8x128xf32>
    %c3_i32_43 = arith.constant 3 : i32
    %c4_i32_44 = arith.constant 4 : i32
    %156 = arith.muli %arg1, %c4_i32_44 : i32
    %157 = arith.addi %156, %c3_i32_43 : i32
    %c1_i32_45 = arith.constant 1 : i32
    %158 = arith.subi %c1_i32_45, %arg0 : i32
    %159 = arith.muli %158, %c3_i32_43 : i32
    %c3_i32_46 = arith.constant 3 : i32
    %160 = arith.subi %c3_i32_46, %c3_i32_43 : i32
    %161 = arith.muli %arg0, %160 : i32
    %162 = arith.addi %159, %161 : i32
    %c1_i32_47 = arith.constant 1 : i32
    %163 = arith.subi %c1_i32_47, %arg0 : i32
    %164 = arith.muli %163, %157 : i32
    %c7_i32_48 = arith.constant 7 : i32
    %165 = arith.subi %c7_i32_48, %157 : i32
    %166 = arith.muli %arg0, %165 : i32
    %167 = arith.addi %164, %166 : i32
    %c0_49 = arith.constant 0 : index
    %168 = arith.index_cast %162 : i32 to index
    %c0_50 = arith.constant 0 : index
    %c0_51 = arith.constant 0 : index
    %169 = vector.load %arg2[%c0_49, %168, %c0_50, %c0_51] : memref<1x4x8x384xf32, #tpu.memory_space<vmem>>, vector<1x1x8x384xf32>
    %170 = vector.shape_cast %169 : vector<1x1x8x384xf32> to vector<8x384xf32>
    %cst_52 = arith.constant dense<0.000000e+00> : vector<8x384xf32>
    %171 = tpu.matmul %155, %5, %cst_52 {dimension_numbers = #tpu.dot_dimension_numbers<[1], [0], [0], [1], [0, 0, 1, 1], [], []>} : vector<8x128xf32>, vector<128x384xf32>, vector<8x384xf32> -> vector<8x384xf32>
    %172 = vector.extract_strided_slice %170 {offsets = [0, 0], sizes = [8, 128], strides = [1, 1]} : vector<8x384xf32> to vector<8x128xf32>
    %173 = vector.extract_strided_slice %171 {offsets = [0, 0], sizes = [8, 128], strides = [1, 1]} : vector<8x384xf32> to vector<8x128xf32>
    %174 = arith.addf %172, %173 : vector<8x128xf32>
    %175 = arith.negf %174 : vector<8x128xf32>
    %176 = math.exp %175 : vector<8x128xf32>
    %cst_53 = arith.constant 1.000000e+00 : f32
    %177 = vector.broadcast %cst_53 : f32 to vector<8x128xf32>
    %178 = arith.addf %177, %176 : vector<8x128xf32>
    %179 = arith.divf %177, %178 : vector<8x128xf32>
    %180 = vector.extract_strided_slice %170 {offsets = [0, 128], sizes = [8, 128], strides = [1, 1]} : vector<8x384xf32> to vector<8x128xf32>
    %181 = vector.extract_strided_slice %171 {offsets = [0, 128], sizes = [8, 128], strides = [1, 1]} : vector<8x384xf32> to vector<8x128xf32>
    %182 = arith.addf %180, %181 : vector<8x128xf32>
    %183 = arith.negf %182 : vector<8x128xf32>
    %184 = math.exp %183 : vector<8x128xf32>
    %cst_54 = arith.constant 1.000000e+00 : f32
    %185 = vector.broadcast %cst_54 : f32 to vector<8x128xf32>
    %186 = arith.addf %185, %184 : vector<8x128xf32>
    %187 = arith.divf %185, %186 : vector<8x128xf32>
    %188 = vector.extract_strided_slice %170 {offsets = [0, 256], sizes = [8, 128], strides = [1, 1]} : vector<8x384xf32> to vector<8x128xf32>
    %189 = vector.extract_strided_slice %171 {offsets = [0, 256], sizes = [8, 128], strides = [1, 1]} : vector<8x384xf32> to vector<8x128xf32>
    %190 = vector.broadcast %7 : vector<1x128xf32> to vector<8x128xf32>
    %191 = arith.addf %189, %190 : vector<8x128xf32>
    %192 = arith.mulf %179, %191 : vector<8x128xf32>
    %193 = arith.addf %188, %192 : vector<8x128xf32>
    %194 = math.tanh %193 : vector<8x128xf32>
    %cst_55 = arith.constant 1.000000e+00 : f32
    %195 = vector.broadcast %cst_55 : f32 to vector<8x128xf32>
    %196 = arith.subf %195, %187 : vector<8x128xf32>
    %197 = arith.mulf %196, %194 : vector<8x128xf32>
    %198 = arith.mulf %187, %155 : vector<8x128xf32>
    %199 = arith.addf %197, %198 : vector<8x128xf32>
    %200 = vector.broadcast %167 : i32 to vector<8x1xi32>
    %201 = arith.cmpi slt, %200, %3 : vector<8x1xi32>
    %202 = vector.shape_cast %201 : vector<8x1xi1> to vector<8x1xi1>
    %203 = vector.broadcast %202 : vector<8x1xi1> to vector<8x128xi1>
    %204 = arith.select %203, %199, %155 : vector<8x128xi1>, vector<8x128xf32>
    %c4_i32_56 = arith.constant 4 : i32
    %c0_57 = arith.constant 0 : index
    %c0_58 = arith.constant 0 : index
    %205 = vector.load %arg7[%c0_57, %c0_58] : memref<8x128xf32, #tpu.memory_space<vmem>>, vector<8x128xf32>
    tpu.vector_store %arg7[%c0_57, %c0_58], %204 {strides = array<i32>} : memref<8x128xf32, #tpu.memory_space<vmem>>, vector<8x128xf32>,
    %c1_i32_59 = arith.constant 1 : i32
    %206 = arith.cmpi eq, %arg1, %c1_i32_59 : i32
    %207 = arith.extui %206 : i1 to i32
    %c0_i32_60 = arith.constant 0 : i32
    %208 = arith.cmpi ne, %207, %c0_i32_60 : i32
    scf.if %208 {
      %c0_61 = arith.constant 0 : index
      %c0_62 = arith.constant 0 : index
      %209 = vector.load %arg7[%c0_61, %c0_62] : memref<8x128xf32, #tpu.memory_space<vmem>>, vector<8x128xf32>
      %c0_63 = arith.constant 0 : index
      %c0_64 = arith.constant 0 : index
      %c0_65 = arith.constant 0 : index
      %210 = vector.load %arg6[%c0_63, %c0_64, %c0_65] : memref<1x8x128xf32, #tpu.memory_space<vmem>>, vector<1x8x128xf32>
      %211 = vector.shape_cast %210 : vector<1x8x128xf32> to vector<8x128xf32>
      %212 = vector.shape_cast %209 : vector<8x128xf32> to vector<1x8x128xf32>
      tpu.vector_store %arg6[%c0_63, %c0_64, %c0_65], %212 {strides = array<i32>} : memref<1x8x128xf32, #tpu.memory_space<vmem>>, vector<1x8x128xf32>,
    } else {
    }
    return
  }
  func.func @transform_0(%arg0: i32, %arg1: i32) -> (i32, i32, i32, i32) {
    %c2_i32 = arith.constant 2 : i32
    %0 = arith.muli %c2_i32, %arg1 : i32
    %c1_i32 = arith.constant 1 : i32
    %1 = arith.subi %c1_i32, %0 : i32
    %2 = arith.muli %arg0, %1 : i32
    %3 = arith.addi %arg1, %2 : i32
    %c0_i32 = arith.constant 0 : i32
    %c0_i32_0 = arith.constant 0 : i32
    %c0_i32_1 = arith.constant 0 : i32
    return %arg0, %3, %c0_i32, %c0_i32_0 : i32, i32, i32, i32
  }
  func.func @transform_1(%arg0: i32, %arg1: i32) -> (i32, i32) {
    %c0_i32 = arith.constant 0 : i32
    %c0_i32_0 = arith.constant 0 : i32
    %c0_i32_1 = arith.constant 0 : i32
    return %c0_i32, %c0_i32_0 : i32, i32
  }
  func.func @transform_2(%arg0: i32, %arg1: i32) -> (i32, i32, i32) {
    %c0_i32 = arith.constant 0 : i32
    %c0_i32_0 = arith.constant 0 : i32
    %c0_i32_1 = arith.constant 0 : i32
    return %arg0, %c0_i32, %c0_i32_0 : i32, i32, i32
  }
  func.func @transform_3(%arg0: i32, %arg1: i32) -> (i32, i32, i32) {
    %c0_i32 = arith.constant 0 : i32
    %c0_i32_0 = arith.constant 0 : i32
    %c0_i32_1 = arith.constant 0 : i32
    return %arg0, %c0_i32, %c0_i32_0 : i32, i32, i32
  }
  func.func @transform_4(%arg0: i32, %arg1: i32) -> (i32, i32, i32) {
    %c0_i32 = arith.constant 0 : i32
    %c0_i32_0 = arith.constant 0 : i32
    %c0_i32_1 = arith.constant 0 : i32
    return %arg0, %c0_i32, %c0_i32_0 : i32, i32, i32
  }
}

</mosaic_0001>

<bundles_post_ra>
// kernel: tpu_custom_call.1
= control target key start
LH: loop header
LB: loop body
LE: loop exit
PB: predicated region body
PF: predicated region fallthrough
CT: control target
= control target key end

     0   :  { %s2654_s0 = inlined_call_operand.hbm [shape: f32[2,8,8,384], index: 0, kind: input, shape index: {}]   ;;  %s2655_s1 = inlined_call_operand.vmem [shape: s32[8,1], index: 1, kind: input, shape index: {}]   ;;  %s2656_s2 = inlined_call_operand.hbm [shape: f32[2,128,384], index: 2, kind: input, shape index: {}]   ;;  %s2657_s3 = inlined_call_operand.vmem [shape: f32[2,1,128], index: 3, kind: input, shape index: {}]   ;;  %s2658_s4 = inlined_call_operand.hbm [shape: f32[2,8,128], index: 4, kind: output, shape index: {}]  }
   0x1   :  { %2674 = sst [smem:[#allocation18_spill]] %s2655_s1 }
   0x2   :  { %2675 = sst [smem:[#allocation19_spill]] %s2656_s2 }
   0x3   :  { %2676 = sst [smem:[#allocation20_spill]] %s2658_s4 }
   0x4   :  { %9 = vsyncpa [#allocation4], 0 }
   0x5   :  { %11 = vsyncpa [#allocation4 + $0x1], 0 }
   0x6   :  { %12 = vsyncpa [#allocation7], 0 }
   0x7   :  { %13 = vsyncpa [#allocation5], 0 }
   0x8   :  { %15 = vsyncpa [#allocation5 + $0x1], 0  ;;  %s2085_s15 = smov 0   ;;  %s2087_s16 = smov 0  }
   0x9   :  { %s2089_s17 = smov 0   ;;  %s2091_s18 = smov 0  }
   0xa   :  { %s2093_s19 = smov 0   ;;  %s2095_s20 = smov 0  }
   0xb   :  { %s2097_s21 = smov 0   ;;  %s2099_s22 = smov 0  }
   0xc   :  { %s2101_s23 = smov 0   ;;  %s2103_s24 = smov 0  }
   0xd   :  { %s2105_s25 = smov 0  }
   0xe LB: > { %2677 = sst [smem:[#allocation12_spill]] %s2008_s15  ;;  %s1226_s26 = sadd.s32 4294967295, %s2048_s25   ;;  %s2048_s25 = sphi %s2105_s25, %s21_s25   ;;  %s2044_s24 = sphi %s2103_s24, %s2717_s24   ;;  %s2040_s23 = sphi %s2101_s23, %s2716_s23   ;;  %s2036_s22 = sphi %s2099_s22, %s2715_s22   ;;  %s2032_s21 = sphi %s2097_s21, %s2707_s21   ;;  %s2028_s20 = sphi %s2095_s20, %s2714_s20   ;;  %s2024_s19 = sphi %s2093_s19, %s2713_s19   ;;  %s2020_s18 = sphi %s2091_s18, %s2712_s18   ;;  %s2016_s17 = sphi %s2089_s17, %s2711_s17   ;;  %s2012_s16 = sphi %s2087_s16, %s2710_s16   ;;  %s2008_s15 = sphi %s2085_s15, %s2709_s15  }
   0xf   : > { %2678 = sst [smem:[#allocation13_spill]] %s2032_s21  ;;  %p63_p0 = scmp.ne.s32.totalorder %s2024_s19, %s2020_s18 }
  0x10   : > { %2679 = sst [smem:[#allocation14_spill]] %s2040_s23  ;;  %p64_p1 = scmp.eq.s32.totalorder %s1226_s26, 0 }
  0x11   : > { %s1227_s27 = sadd.s32 4294967294, %s2048_s25   ;;  %p110_p2 = scmp.ne.s32.totalorder %s2012_s16, %s2008_s15 }
  0x12   : > { %p2143_p3 = por %p64_p1, %p63_p0  ;;  %p159_p4 = scmp.ne.s32.totalorder %s2016_s17, %s2012_s16 }
  0x13   : > { %p2149_p5 = por %p110_p2, %p64_p1  ;;  %p160_p6 = scmp.eq.s32.totalorder %s1226_s26, 3 }
  0x14   : > { %s2680_s28 = scalar_select %p2143_p3, 1, 0 }
  0x15   : > { %s2681_s29 = scalar_select %p2149_p5, 1, 0 }
  0x16   : > { %p166_p7 = scmp.eq.s32.totalorder %s1227_s27, 3  ;;  %p1230_p8 = scmp.ge.s32.totalorder %s2048_s25, 1 }
  0x17   : > { %p2154_p9 = por %p160_p6, %p159_p4  ;;  %p173_p10 = scmp.lt.s32.totalorder %s2048_s25, 5 }
  0x18   : > { %p2159_p11 = por %p166_p7, %p110_p2  ;;  %s1699_s6 = smul.u32 6144, %s2036_s22 }
  0x19   : > { %s2682_s30 = scalar_select %p2154_p9, 1, 0 }
  0x1a   : > { %s2684_s5 = scalar_select %p2159_p11, 1, 0 }
  0x1b   : > { %2683 = sst [smem:[#allocation15_spill]] %s2682_s30  ;;  %p2164_p12 = pnand %p1230_p8, %p173_p10 }
  0x1c   : > { %2685 = sst [smem:[#allocation16_spill]] %s2684_s5  ;;  %s2687_s2 = sld [smem:[#allocation19_spill]] }
  0x1d   : > { %s2686_s7 = scalar_select %p2164_p12, 1, 0 }
  0x1e   : > { %s2050_s11 = smov [#allocation6]   ;;  %p1710_p13 = pneg %p2164_p12 }
  0x1f   : > { %s191_s12 = sshll.u32 %s2050_s11, 4  ;;  %s2175_s12 = int_to_ptr.vmem [resolvable:$true] %s191_s12 }
  0x20   : > { %p2179_p0 = pnand %p1710_p13, %p2149_p5 }
  0x22   : > { %s2171_s10 = scalar_lea.hbm %s2687_s2, %s1699_s6  ;;  %p1864_p2 = pneg %p2179_p0 }
  0x23   : > { %s1862_s14 = scalar_lea.hbm %s2171_s10, 6144  ;;  %s1867_s27 = scalar_lea.hbm %s2687_s2, 12288 }
  0x24   : > { %p1863_p1 = scmp.ne.s32.totalorder %s2171_s10, %s1862_s14  ;;  %p1868_p7 = scmp.lt.u32.totalorder %s2171_s10, %s2687_s2 }
  0x25   : > { %p1869_p8 = scmp.lt.u32.totalorder %s1867_s27, %s1862_s14  ;;  %p1871_p13 = scmp.lt.u32.totalorder %s1862_s14, %s2171_s10 }
  0x26   : > { %p1865_p4 = pnand %p1864_p2, %p1863_p1 }
  0x27   : > { %p1870_p10 = por %p1869_p8, %p1868_p7 }
  0x28   : > { %p1866_p6 = pneg %p1865_p4 }
  0x29   : > { %p1872_p11 = por %p1871_p13, %p1870_p10 }
  0x2b   : > { %p1873_p9 = pnand %p1872_p11, %p1866_p6 }
  0x2d   : > { %1876 = shalt.err (!%p1873_p9)
}
  0x2e   : > { %s1877_s9 = scalar_lea.vmem %s2175_s12, 6144  ;;  %p1885_p3 = scmp.lt.s32.totalorder %s2175_s12, %s2175_s12 }
  0x2f   : > { %p1878_p1 = scmp.ne.s32.totalorder %s2175_s12, %s1877_s9  ;;  %p1886_p12 = scmp.lt.s32.totalorder %s1877_s9, %s1877_s9 }
  0x31   : > { %p1880_p4 = pnand %p1878_p1, %p1864_p2  ;;  %p1887_p7 = por %p1886_p12, %p1885_p3 }
  0x33   : > { %p1881_p5 = pneg %p1880_p4 }
  0x35   : > { %p1888_p8 = pnand %p1887_p7, %p1881_p5 }
  0x37   : > { %1891 = shalt.err (!%p1888_p8)
}
  0x38   : > { %s2664_s11 = smov 384   ;;  %s2665_s14 = smov 24  }
  0x39   : > { %1713 = dma.hbm_to_vmem [thread:$0]  (!%p2179_p0), %s2171_s10, 6144, %s2175_s12, [#allocation7], %s2664_s11, %s2664_s11, %s2665_s14  }
  0x3a   : > { %s97_s18 = sadd.s32 1, %s2016_s17  ;;  %s30_s26 = sadd.s32 1, %s2040_s23 }
  0x3b   : > { %p31_p3 = scmp.ge.s32.totalorder %s30_s26, 2  ;;  %s33_s27 = sadd.s32 1, %s2044_s24 }
  0x3c   : > { %s1228_s6 = sshll.u32 %s2040_s23, 1  ;;  %p57_p9 = scmp.ne.s32.totalorder %s2028_s20, %s2024_s19 }
  0x3d   : > { %s2719_s26 = smov (%p31_p3, %s30_s26), 0  ;;  %s2721_s27 = smov (!%p31_p3, %s33_s27), %s2044_s24 }
  0x3e   : > { %s38_s8 = ssub.s32 1, %s1228_s6  ;;  %s1229_s13 = sshll.u32 %s2719_s26, 1 }
  0x3f   : > { %p35_p5 = scmp.ge.s32.totalorder %s2721_s27, 2  ;;  %s39_s9 = smul.u32 %s2044_s24, %s38_s8 }
  0x40   : > { %s42_s10 = ssub.s32 1, %s1229_s13  ;;  %p58_p11 = scmp.eq.s32.totalorder %s2048_s25, 0 }
  0x41   : > { %s2723_s27 = smov (%p35_p5, %s2721_s27), 0  ;;  %s40_s12 = sadd.s32 %s2040_s23, %s39_s9 }
  0x42   : > { %2689 = sst [smem:[#allocation17_spill]] %s2723_s27  ;;  %s43_s11 = smul.u32 %s42_s10, %s2723_s27 }
  0x43   : > { %s45_s14 = ssub.s32 %s2044_s24, %s2723_s27  ;;  %s50_s2 = sadd.s32 1, %s2028_s20 }
  0x44   : > { %p2231_p12 = por %p58_p11, %p57_p9  ;;  %s44_s8 = sadd.s32 %s43_s11, %s2719_s26 }
  0x45   : > { %p95_p0 = scmp.eq.s32.totalorder %s45_s14, 0  ;;  %s46_s13 = ssub.s32 %s40_s12, %s44_s8 }
  0x46   : > { %s211_s5 = sand.u32 1, %s2028_s20   ;;  %s47_s15 = sor.u32 %s46_s13, %s45_s14 }
  0x47   : > { %p1722_p2 = scmp.lt.s32.totalorder %s2048_s25, 4  ;;  %p48_p6 = scmp.eq.s32.totalorder %s47_s15, 0 }
  0x48   : > { %s1700_s4 = smul.u32 96, %s211_s5  ;;  %s1897_s6 = scalar_lea.hbm %s2654_s0, 6144 }
  0x49   : > { %s2239_s30 = scalar_select %p95_p0, %s2016_s17, %s97_s18  }
  0x4a   : > { %s2242_s9 = scalar_select %p48_p6, %s2028_s20, %s50_s2  }
  0x4b   : > { %s1701_s10 = smul.u32 12, %s40_s12  ;;  %s215_s23 = scalar_lea.vmem [#allocation3], %s1700_s4 }
  0x4c   : > { %s1702_s27 = smul.u32 24, %s2044_s24  ;;  %s229_s1 = sshll.u32 %s215_s23, 4  ;;  %s2251_s1 = int_to_ptr.vmem [resolvable:$true] %s229_s1 }
  0x4d   : > { %p2247_p10 = pnand %p1722_p2, %p2231_p12  ;;  %s2258_s4 = scalar_lea.sflag [#allocation4], %s211_s5 }
  0x4e   : > { %s226_s11 = sadd.s32 %s1702_s27, %s1701_s10 }
  0x4f   : > { %s1236_s15 = sshll.u32 %s226_s11, 7  ;;  %p1894_p1 = pneg %p2247_p10 }
  0x50   : > { %s2256_s2 = scalar_lea.hbm %s2654_s0, %s1236_s15 }
  0x51   : > { %s1892_s23 = scalar_lea.hbm %s2256_s2, 1536  ;;  %p1898_p8 = scmp.lt.u32.totalorder %s2256_s2, %s2654_s0 }
  0x52   : > { %p1893_p13 = scmp.ne.s32.totalorder %s2256_s2, %s1892_s23  ;;  %p1899_p3 = scmp.lt.u32.totalorder %s1897_s6, %s1892_s23 }
  0x53   : > { %p1901_p9 = scmp.lt.u32.totalorder %s1892_s23, %s2256_s2 }
  0x54   : > { %p1895_p4 = pnand %p1894_p1, %p1893_p13  ;;  %p1900_p5 = por %p1899_p3, %p1898_p8 }
  0x56   : > { %p1896_p7 = pneg %p1895_p4  ;;  %p1902_p11 = por %p1901_p9, %p1900_p5 }
  0x58   : > { %p1903_p12 = pnand %p1902_p11, %p1896_p7 }
  0x5a   : > { %1906 = shalt.err (!%p1903_p12)
}
  0x5b   : > { %s1907_s5 = scalar_lea.vmem %s2251_s1, 1536  ;;  %s2053_s10 = smov [#allocation3]  }
  0x5c   : > { %p1908_p0 = scmp.ne.s32.totalorder %s2251_s1, %s1907_s5  ;;  %s1912_s11 = sshll.u32 %s2053_s10, 4  ;;  %s1913_s11 = int_to_ptr.vmem [resolvable:$false] %s1912_s11 }
  0x5d   : > { %s1914_s15 = scalar_lea.vmem %s1913_s11, 3072  ;;  %p1915_p13 = scmp.lt.s32.totalorder %s2251_s1, %s1913_s11 }
  0x5e   : > { %p1910_p2 = pnand %p1908_p0, %p1894_p1  ;;  %p1916_p4 = scmp.lt.s32.totalorder %s1914_s15, %s1907_s5 }
  0x60   : > { %p1911_p6 = pneg %p1910_p2  ;;  %p1917_p8 = por %p1916_p4, %p1915_p13 }
  0x62   : > { %p1918_p3 = pnand %p1917_p8, %p1911_p6 }
  0x64   : > { %1921 = shalt.err (!%p1918_p3)
}
  0x65   : > { %s2692_s14 = smov 24   ;;  %s2693_s18 = smov 384  }
  0x66   : > { %1717 = dma.hbm_to_vmem [thread:$0]  (!%p2247_p10), %s2256_s2, 1536, %s2251_s1, %s2258_s4, %s2693_s18, %s2693_s18, %s2692_s14  }
  0x67   : > { %p2694_p1 = scmp.ne.s32.totalorder %s2686_s7, 0 }
  0x68   : > { %s243_s23 = sand.u32 (!%p2694_p1), 1, %s2024_s19   ;;  %p2695_p7 = scmp.ne.s32.totalorder (!%p2694_p1), %s2680_s28, 0 }
  0x69   : > { %241 = sbr.rel (%p2694_p1) target bundleno = 1243 (0x4db), region = 36  ;;  %s244_s12 = scalar_lea.sflag (!%p2694_p1), [#allocation4], %s243_s23 }
  0x6a   : > { %s1703_s27 = smul.u32 (!%p2694_p1), 96, %s243_s23 }
  0x6c   : > { %s2292_s6 = scalar_lea.vmem (!%p2694_p1), [#allocation3], %s1703_s27 }
  0x70   : > { %1995 = dma.done.wait (%p2695_p7), %s244_s12, 1536  }
  0x71   : > { %1997 = vsyncadd (%p2695_p7), %s244_s12, 4294965760  ;;  %p2696_p5 = scmp.ne.s32.totalorder %s2681_s29, 0 }
  0x73   : > { %1999 = dma.done.wait (%p2696_p5), [#allocation7], 6144  }
  0x74   : > { %2001 = vsyncadd (%p2696_p5), [#allocation7], 4294961152  ;;  %s276_s1 = sand.u32 1, %s2012_s16   ;;  %p284_p10 = scmp.lt.s32.totalorder %s2036_s22, 1 }
  0x75   : > { %s2306_s21 = sshll.u32 %s276_s1, 3  ;;  %s2697_s29 = sld [smem:[#allocation13_spill]] }
  0x76   : > { %s2309_s7 = scalar_select %p284_p10, %s2036_s22, 1 }
  0x77   : > { %s278_s8 = scalar_lea.vmem [#allocation8], %s2306_s21 }
  0x78   : > { %s286_s4 = scalar_lea.vmem %s2657_s3, %s2309_s7 }
  0x7b   : > { %p1239_p9 = scmp.ne.s32.totalorder %s2697_s29, 0 }
  0x7c   : > { %v2054_v0 = vmov (!%p1239_p9), 0.0  }
  0x7d   : > { %290 = sbr.rel (%p1239_p9) target bundleno = 132 (0x84), region = 48  ;;  %291 = vst [vmem:[#allocation2] sm:$0xff] (!%p1239_p9), %v2054_v0 }
  0x84 PF: > { %v294_v1 = vld [vmem:[#allocation6 + $0x8] sm:$0xff]  ;;  %s2698_s13 = sld [smem:[#allocation13_spill]]  ;;  %v297_v2 = vld [vmem:[#allocation6 + $0x20] sm:$0xff]  ;;  %v296_v5 = vld [vmem:[#allocation6 + $0x18] sm:$0xff]  ;;  %v2055_v8 = vmov 0.0|0.0   ;;  %v2056_v9 = vmov 0.0  }
  0x85   : > { %v293_v3 = vld [vmem:[#allocation6] sm:$0xff]  ;;  %v2317_v4 = vpack.c.bf16 %v297_v2, %v294_v1  ;;  %v300_v6 = vld [vmem:[#allocation6 + $0x38] sm:$0xff]  ;;  %v303_v7 = vld [vmem:[#allocation6 + $0x50] sm:$0xff]  ;;  %1507 = vmatprep.subr.bf16.mxu1 %v2055_v8  ;;  %420 = vmatprep.mubr.f32.mxu0 %v2056_v9  ;;  %s2325_s10 = ssub.s32 1, %s2036_s22  ;;  %vm2057_vm0 = vmmov 0   ;;  %v2058_v15 = vmov 0  }
  0x86   : > { %v2327_v10 = vpack.c.bf16 %v296_v5, %v293_v3  ;;  %v2329_v11 = vpack.c.bf16 %v303_v7, %v300_v6  ;;  %v299_v12 = vld [vmem:[#allocation6 + $0x30] sm:$0xff]  ;;  %v302_v13 = vld [vmem:[#allocation6 + $0x48] sm:$0xff]  ;;  %1367 = vmatprep.mubr.msk.f32.mxu1 %vm2057_vm0, %v2056_v9  ;;  %1820 = vset.pattern.permute.xlu0 %v2058_v15  ;;  %v309_v16 = vld [vmem:[#allocation6 + $0x80] sm:$0xff] }
  0x87   : > { %v306_v14 = vld [vmem:[#allocation6 + $0x68] sm:$0xff]  ;;  %1476 = vmatprep.subr.bf16.mxu0 %v2317_v4  ;;  %1821 = vset.pattern.permute.xlu1 %v2058_v15  ;;  %v2339_v17 = vpack.c.bf16 %v302_v13, %v299_v12  ;;  %v305_v19 = vld [vmem:[#allocation6 + $0x60] sm:$0xff]  ;;  %v308_v20 = vld [vmem:[#allocation6 + $0x78] sm:$0xff] }
  0x88   : > { %1478 = vmatpush1.bf16.msra.mxu0 %v2327_v10  ;;  %v2345_v18 = vpack.c.bf16 %v309_v16, %v306_v14  ;;  %v312_v21 = vld [vmem:[#allocation6 + $0x98] sm:$0xff]  ;;  %v315_v22 = vld [vmem:[#allocation6 + $0xb0] sm:$0xff]  ;;  %v2355_v23 = vpack.c.bf16 %v308_v20, %v305_v19  ;;  %v314_v26 = vld [vmem:[#allocation6 + $0xa8] sm:$0xff] }
  0x89   : > { %1480 = vmatprep.subr.bf16.mxu0 %v2329_v11  ;;  %v311_v24 = vld [vmem:[#allocation6 + $0x90] sm:$0xff]  ;;  %v2358_v25 = vpack.c.bf16 %v315_v22, %v312_v21  ;;  %v298_v28 = vld [vmem:[#allocation6 + $0x28] sm:$0xff]  ;;  %v321_v30 = vld [vmem:[#allocation6 + $0xe0] sm:$0xff] }
  0x8a   : > { %s2322_s5 = sshll.u32 %s2698_s13, 2  ;;  %v295_v27 = vld [vmem:[#allocation6 + $0x10] sm:$0xff]  ;;  %v318_v29 = vld [vmem:[#allocation6 + $0xc8] sm:$0xff]  ;;  %v301_v32 = vld [vmem:[#allocation6 + $0x40] sm:$0xff]  ;;  %v2365_v34 = vpack.c.bf16 %v314_v26, %v311_v24  ;;  %p1258_p11 = scmp.ne.s32.totalorder %s2698_s13, 1 }
  0x8b   : > { %s347_s11 = ssub.s32 7, %s2322_s5  ;;  %s533_s15 = sadd.s32 1, %s2322_s5  ;;  %v2360_v31 = vpack.c.bf16 %v298_v28, %v295_v27  ;;  %v304_v33 = vld [vmem:[#allocation6 + $0x58] sm:$0xff]  ;;  %v317_v35 = vld [vmem:[#allocation6 + $0xc0] sm:$0xff]  ;;  %v2371_v37 = vpack.c.bf16 %v321_v30, %v318_v29  ;;  %v307_v39 = vld [vmem:[#allocation6 + $0x70] sm:$0xff] }
  0x8c   : > { %s346_s14 = smul.u32 %s2322_s5, %s2325_s10  ;;  %s537_s18 = ssub.s32 6, %s2322_s5  ;;  %1482 = vmatpush1.bf16.msra.mxu0 %v2339_v17  ;;  %v2368_v36 = vpack.c.bf16 %v304_v33, %v301_v32  ;;  %v320_v38 = vld [vmem:[#allocation6 + $0xd8] sm:$0xff]  ;;  %v310_v40 = vld [vmem:[#allocation6 + $0x88] sm:$0xff]  ;;  %v327_v42 = vld [vmem:[#allocation6 + $0x110] sm:$0xff] }
  0x8d   : > { %s348_s23 = smul.u32 %s2036_s22, %s347_s11  ;;  %1484 = vmatprep.subr.bf16.mxu0 %v2345_v18  ;;  %1509 = vmatpush3.bf16.msra.mxu1 %v2360_v31  ;;  %v324_v41 = vld [vmem:[#allocation6 + $0xf8] sm:$0xff]  ;;  %v2375_v45 = vpack.c.bf16 %v320_v38, %v317_v35  ;;  %v323_v46 = vld [vmem:[#allocation6 + $0xf0] sm:$0xff]  ;;  %v2378_v47 = vpack.c.bf16 %v310_v40, %v307_v39  ;;  %v326_v50 = vld [vmem:[#allocation6 + $0x108] sm:$0xff]  ;;  %s717_s7 = sadd.s32 2, %s2322_s5 }
  0x8e   : > { %s2349_s27 = smul.u32 %s533_s15, %s2325_s10  ;;  %1510 = vmatprep.subr.bf16.mxu1 %v2055_v8  ;;  %s2699_s15 = sld [smem:[#allocation18_spill]]  ;;  %v2386_v49 = vpack.c.bf16 %v327_v42, %v324_v41  ;;  %v313_v51 = vld [vmem:[#allocation6 + $0xa0] sm:$0xff]  ;;  %v316_v52 = vld [vmem:[#allocation6 + $0xb8] sm:$0xff]  ;;  %v330_v53 = vld [vmem:[#allocation6 + $0x128] sm:$0xff]  ;;  %v2393_v56 = vpack.c.bf16 %v326_v50, %v323_v46 }
  0x8f   : > { %s2352_s12 = smul.u32 %s2036_s22, %s537_s18  ;;  %s349_s28 = sadd.s32 %s348_s23, %s346_s14  ;;  %v333_v54 = vld [vmem:[#allocation6 + $0x140] sm:$0xff]  ;;  %v2396_v58 = vpack.c.bf16 %v316_v52, %v313_v51  ;;  %v332_v61 = vld [vmem:[#allocation6 + $0x138] sm:$0xff]  ;;  %v319_v62 = vld [vmem:[#allocation6 + $0xd0] sm:$0xff] }
  0x90   : > { %1486 = vmatpush1.bf16.msra.mxu0 %v2355_v23  ;;  %v525_v43 = vstv %s349_s28  ;;  %v329_v57 = vld [vmem:[#allocation6 + $0x120] sm:$0xff]  ;;  %v2400_v60 = vpack.c.bf16 %v333_v54, %v330_v53  ;;  %v322_v63 = vld [vmem:[#allocation6 + $0xe8] sm:$0xff]  ;;  %v336_v0 = vld [vmem:[#allocation6 + $0x158] sm:$0xff]  ;;  %s1263_s14 = smul.u32 72, %s2036_s22  ;;  %s901_s28 = sadd.s32 3, %s2322_s5 }
  0x91   : > { %s539_s2 = sadd.s32 %s2352_s12, %s2349_s27  ;;  %1488 = vmatprep.subr.bf16.mxu0 %v2358_v25  ;;  %1512 = vmatpush3.bf16.msra.mxu1 %v2368_v36  ;;  %v339_v1 = vld [vmem:[#allocation6 + $0x170] sm:$0xff]  ;;  %v2404_v2 = vpack.c.bf16 %v332_v61, %v329_v57  ;;  %v2407_v5 = vpack.c.bf16 %v322_v63, %v319_v62  ;;  %v338_v7 = vld [vmem:[#allocation6 + $0x168] sm:$0xff]  ;;  %v325_v12 = vld [vmem:[#allocation6 + $0x100] sm:$0xff]  ;;  %s720_s12 = smul.u32 %s717_s7, %s2325_s10 }
  0x92   : > { %v709_v44 = vstv %s539_s2  ;;  %1513 = vmatprep.subr.bf16.mxu1 %v2055_v8  ;;  %v335_v3 = vld [vmem:[#allocation6 + $0x150] sm:$0xff]  ;;  %v2410_v6 = vpack.c.bf16 %v339_v1, %v336_v0  ;;  %v328_v13 = vld [vmem:[#allocation6 + $0x118] sm:$0xff]  ;;  %v334_v20 = vld [vmem:[#allocation6 + $0x148] sm:$0xff]  ;;  %s352_s18 = scalar_lea.vmem %s2292_s6, %s1263_s14 [#allocation3]  ;;  %s904_s29 = ssub.s32 4, %s2322_s5 }
  0x93   : > { %v2414_v14 = vpack.c.bf16 %v338_v7, %v335_v3  ;;  %v2417_v16 = vpack.c.bf16 %v328_v13, %v325_v12  ;;  %v331_v19 = vld [vmem:[#allocation6 + $0x130] sm:$0xff]  ;;  %v2422_v21 = vld [vmem:[#allocation2] sm:$0xff]  ;;  %v337_v24 = vld [vmem:[#allocation6 + $0x160] sm:$0xff]  ;;  %s903_s11 = smul.u32 %s901_s28, %s2325_s10  ;;  %s1246_s23 = sshll.u32 %s2036_s22, 1 }
  0x94   : > { %1490 = vmatpush1.bf16.msra.mxu0 %v2365_v34  ;;  %v2383_v48 = vld [vmem:[%s2699_s15] sm:$0xff]  ;;  %v2425_v22 = vpack.c.bf16 %v334_v20, %v331_v19  ;;  %v354_v32 = vld [vmem:[%s352_s18 + $0x8] sm:$0xff]  ;;  %v355_v53 = vld [vmem:[%s352_s18 + $0x10] sm:$0xff]  ;;  %s905_s14 = smul.u32 %s2036_s22, %s904_s29  ;;  %s535_s27 = sadd.s32 %s1246_s23, %s2325_s10 }
  0x95   : > { %1492 = vmatprep.subr.bf16.mxu0 %v2371_v37  ;;  %vm526_vm1 = vcmp.lt.s32.totalorder %v525_v43, %v2383_v48  ;;  %vm710_vm2 = vcmp.lt.s32.totalorder %v709_v44, %v2383_v48  ;;  %1515 = vmatpush3.bf16.msra.mxu1 %v2378_v47  ;;  %v340_v26 = vld [vmem:[#allocation6 + $0x178] sm:$0xff]  ;;  %s1266_s29 = smul.u32 72, %s2325_s10 }
  0x96   : > { %v527_v55 = vsel %vm526_vm1, 1, %v2058_v15  ;;  %v711_v59 = vsel %vm710_vm2, 1, %v2058_v15  ;;  %1516 = vmatprep.subr.bf16.mxu1 %v2055_v8  ;;  %v2431_v27 = vpack.c.bf16 %v340_v26, %v337_v24  ;;  %v353_v28 = vld [vmem:[%s352_s18] sm:$0xff]  ;;  %s906_s18 = sadd.s32 %s905_s14, %s903_s11 }
  0x97   : > { %529 = vperm.xlu0 %1820, %v527_v55   ;;  %v2479_v46 = vld [vmem:[%s286_s4] ss:$0 sm:$0xff]  ;;  %s721_s4 = ssub.s32 5, %s2322_s5  ;;  %v1076_v12 = vstv %s906_s18  ;;  %s1264_s5 = smul.u32 24, %s535_s27 }
  0x98   : > { %1494 = vmatpush1.bf16.msra.mxu0 %v2375_v45  ;;  %s722_s2 = smul.u32 %s2036_s22, %s721_s4  ;;  %vm1077_vm5 = vcmp.lt.s32.totalorder %v1076_v12, %v2383_v48  ;;  %s1250_s4 = sshll.u32 %s2325_s10, 1 }
  0x99   : > { %1496 = vmatprep.subr.bf16.mxu0 %v2386_v49  ;;  %1518 = vmatpush3.bf16.msra.mxu1 %v2396_v58  ;;  %v1078_v13 = vsel %vm1077_vm5, 1, %v2058_v15  ;;  %s542_s7 = scalar_lea.vmem %s2292_s6, %s1264_s5 [#allocation3]  ;;  %s909_s11 = scalar_lea.vmem %s2292_s6, %s1266_s29 [#allocation3] }
  0x9a   : > { %1519 = vmatprep.subr.bf16.mxu1 %v2055_v8  ;;  %s723_s15 = sadd.s32 %s722_s2, %s720_s12  ;;  %v543_v19 = vld [vmem:[%s542_s7] sm:$0xff]  ;;  %v544_v26 = vld [vmem:[%s542_s7 + $0x8] sm:$0xff]  ;;  %s719_s12 = sadd.s32 %s2036_s22, %s1250_s4 }
  0x9b   : > { %713 = vperm.xlu0 %1820, %v711_v59   ;;  %v893_v7 = vstv %s723_s15  ;;  %s1265_s28 = smul.u32 24, %s719_s12 }
  0x9c   : > { %1498 = vmatpush1.bf16.msra.mxu0 %v2393_v56  ;;  %vm894_vm4 = vcmp.lt.s32.totalorder %v893_v7, %v2383_v48 }
  0x9d   : > { %1500 = vmatprep.subr.bf16.mxu0 %v2400_v60  ;;  %1521 = vmatpush3.bf16.msra.mxu1 %v2407_v5  ;;  %s726_s2 = scalar_lea.vmem %s2292_s6, %s1265_s28 [#allocation3] }
  0x9e   : > { %1522 = vmatprep.subr.bf16.mxu1 %v2055_v8 }
  0xa0   : > { %1502 = vmatpush1.bf16.msra.mxu0 %v2404_v2 }
  0xa1   : > { %1504 = vmatprep.subr.bf16.mxu0 %v2410_v6  ;;  %1524 = vmatpush3.bf16.msra.mxu1 %v2417_v16 }
  0xa2   : > { %1525 = vmatprep.subr.bf16.mxu1 %v2055_v8 }
  0xa4   : > { %1506 = vmatpush1.bf16.msra.mxu0 %v2414_v14 }
  0xa5   : > { %1532 = vmatprep.subr.bf16.mxu0 %v2317_v4  ;;  %1527 = vmatpush3.bf16.msra.mxu1 %v2425_v22 }
  0xa6   : > { %1528 = vmatprep.subr.bf16.mxu1 %v2055_v8 }
  0xa7   : > { %421 = vmatmul.mubr.f32.vlgmr.msra.gmra.mrb[0].mxu0 %v2422_v21 }
  0xa8   : > { %1534 = vmatpush1.bf16.msra.mxu0 %v2327_v10  ;;  %610 = vmatprep.mubr.f32.mxu0 %v2056_v9 }
  0xa9   : > { %1536 = vmatprep.subr.bf16.mxu0 %v2329_v11  ;;  %1530 = vmatpush3.bf16.msra.mxu1 %v2431_v27 }
  0xaa   : > { %1563 = vmatprep.subr.bf16.mxu1 %v2055_v8 }
  0xac   : > { %1538 = vmatpush1.bf16.msra.mxu0 %v2339_v17  ;;  %1368 = vmatmul.mubr.f32.vlgmr.msra.gmra.mrb[0].mxu1 %v2422_v21 }
  0xad   : > { %1540 = vmatprep.subr.bf16.mxu0 %v2345_v18  ;;  %1565 = vmatpush3.bf16.msra.mxu1 %v2360_v31 }
  0xae   : > { %1566 = vmatprep.subr.bf16.mxu1 %v2055_v8  ;;  %1402 = vmatprep.mubr.msk.f32.mxu1 %vm2057_vm0, %v2056_v9 }
  0xb0   : > { %1542 = vmatpush1.bf16.msra.mxu0 %v2355_v23 }
  0xb1   : > { %1544 = vmatprep.subr.bf16.mxu0 %v2358_v25  ;;  %1568 = vmatpush3.bf16.msra.mxu1 %v2368_v36 }
  0xb2   : > { %1569 = vmatprep.subr.bf16.mxu1 %v2055_v8 }
  0xb4   : > { %1546 = vmatpush1.bf16.msra.mxu0 %v2365_v34 }
  0xb5   : > { %1548 = vmatprep.subr.bf16.mxu0 %v2371_v37  ;;  %1571 = vmatpush3.bf16.msra.mxu1 %v2378_v47 }
  0xb6   : > { %1572 = vmatprep.subr.bf16.mxu1 %v2055_v8 }
  0xb8   : > { %1550 = vmatpush1.bf16.msra.mxu0 %v2375_v45 }
  0xb9   : > { %1552 = vmatprep.subr.bf16.mxu0 %v2386_v49  ;;  %1574 = vmatpush3.bf16.msra.mxu1 %v2396_v58 }
  0xba   : > { %1575 = vmatprep.subr.bf16.mxu1 %v2055_v8 }
  0xbc   : > { %1554 = vmatpush1.bf16.msra.mxu0 %v2393_v56 }
  0xbd   : > { %1556 = vmatprep.subr.bf16.mxu0 %v2400_v60  ;;  %1577 = vmatpush3.bf16.msra.mxu1 %v2407_v5 }
  0xbe   : > { %1578 = vmatprep.subr.bf16.mxu1 %v2055_v8 }
  0xc0   : > { %1558 = vmatpush1.bf16.msra.mxu0 %v2404_v2 }
  0xc1   : > { %1560 = vmatprep.subr.bf16.mxu0 %v2410_v6  ;;  %1580 = vmatpush3.bf16.msra.mxu1 %v2417_v16 }
  0xc2   : > { %1581 = vmatprep.subr.bf16.mxu1 %v2055_v8 }
  0xc4   : > { %1562 = vmatpush1.bf16.msra.mxu0 %v2414_v14 }
  0xc5   : > { %1588 = vmatprep.subr.bf16.mxu0 %v2317_v4  ;;  %1583 = vmatpush3.bf16.msra.mxu1 %v2425_v22 }
  0xc6   : > { %1584 = vmatprep.subr.bf16.mxu1 %v2055_v8 }
  0xc9   : > { %1586 = vmatpush3.bf16.msra.mxu1 %v2431_v27 }
  0xca   : > { %1619 = vmatprep.subr.bf16.mxu1 %v2055_v8 }
 0x116   : > { %v530_v0 = vpop.permute.xlu0 %529 }
 0x117   : > { %vm531_vm3 = vcmp.eq.s32.totalorder %v530_v0, 1 }
 0x17a   : > { %v422_v29 = vpop.f32.mrb[0].mxu0 }
 0x17b   : > { %v497_v30 = vadd.f32 %v422_v29, %v353_v28  ;;  %v424_v33 = vpop.f32.mrb[1].mxu0 }
 0x17c   : > { %v504_v38 = vadd.f32 %v424_v33, %v354_v32 }
 0x17d   : > { %v1243_v35 = vmul.f32 -1.442695, %v497_v30 }
 0x17e   : > { %v1244_v39 = vmul.f32 -1.442695, %v504_v38 }
 0x17f   : > { %1822 = vpow2.f32 %v1243_v35  ;;  %v493_v40 = vpop.f32.mrb[0].mxu1 }
 0x180   : > { %v1369_v41 = vpop.f32.mrb[1].mxu1  ;;  %1824 = vpow2.f32 %v1244_v39  ;;  %v517_v51 = vadd.f32 %v2479_v46, %v493_v40 }
 0x181   : > { %v545_v41 = vld [vmem:[%s542_s7 + $0x10] sm:$0xff] }
 0x189   : > { %v1823_v42 = vpop.eup %1822 }
 0x18a   : > { %v501_v43 = vadd.f32 1.0, %v1823_v42  ;;  %v1825_v44 = vpop.eup %1824 }
 0x18b   : > { %v508_v50 = vadd.f32 1.0, %v1825_v44 }
 0x18c   : > { %1826 = vrcp.f32 %v501_v43 }
 0x18d   : > { %1828 = vrcp.f32 %v508_v50 }
 0x196   : > { %v1827_v52 = vpop.eup %1826 }
 0x197   : > { %v518_v54 = vmul.f32 %v1827_v52, %v517_v51  ;;  %v1829_v57 = vpop.eup %1828  ;;  %v714_v52 = vpop.permute.xlu0 %713 }
 0x198   : > { %v521_v59 = vsub.f32 1.0, %v1829_v57  ;;  %v523_v63 = vmul.f32 %v1829_v57, %v2422_v21  ;;  %vm715_vm6 = vcmp.eq.s32.totalorder %v714_v52, 1 }
 0x199   : > { %v519_v55 = vadd.f32 %v518_v54, %v355_v53 }
 0x19b   : > { %1830 = vtanh.f32 %v519_v55 }
 0x1a5   : > { %v1831_v61 = vpop.eup %1830 }
 0x1a6   : > { %v522_v62 = vmul.f32 %v1831_v61, %v521_v59 }
 0x1a8   : > { %v524_v1 = vadd.f32 %v523_v63, %v522_v62  ;;  %v910_v62 = vld [vmem:[%s909_s11] sm:$0xff] }
 0x1aa   : > { %v2484_v3 = vsel %vm531_vm3, %v524_v1, %v2422_v21 }
 0x1ab   : > { %611 = vmatmul.mubr.f32.vlgmr.msra.gmra.mrb[2].mxu0 %v2484_v3  ;;  %1403 = vmatmul.mubr.f32.vlgmr.msra.gmra.mrb[2].mxu1 %v2484_v3 }
 0x1ac   : > { %1590 = vmatpush1.bf16.msra.mxu0 %v2327_v10  ;;  %1621 = vmatpush3.bf16.msra.mxu1 %v2360_v31 }
 0x1ad   : > { %1592 = vmatprep.subr.bf16.mxu0 %v2329_v11  ;;  %1622 = vmatprep.subr.bf16.mxu1 %v2055_v8 }
 0x1ae   : > { %794 = vmatprep.mubr.f32.mxu0 %v2056_v9  ;;  %1437 = vmatprep.mubr.msk.f32.mxu1 %vm2057_vm0, %v2056_v9 }
 0x1b0   : > { %1594 = vmatpush1.bf16.msra.mxu0 %v2339_v17  ;;  %1624 = vmatpush3.bf16.msra.mxu1 %v2368_v36 }
 0x1b1   : > { %1596 = vmatprep.subr.bf16.mxu0 %v2345_v18  ;;  %1625 = vmatprep.subr.bf16.mxu1 %v2055_v8 }
 0x1b4   : > { %1598 = vmatpush1.bf16.msra.mxu0 %v2355_v23  ;;  %1627 = vmatpush3.bf16.msra.mxu1 %v2378_v47 }
 0x1b5   : > { %1600 = vmatprep.subr.bf16.mxu0 %v2358_v25  ;;  %1628 = vmatprep.subr.bf16.mxu1 %v2055_v8 }
 0x1b8   : > { %1602 = vmatpush1.bf16.msra.mxu0 %v2365_v34  ;;  %1630 = vmatpush3.bf16.msra.mxu1 %v2396_v58 }
 0x1b9   : > { %1604 = vmatprep.subr.bf16.mxu0 %v2371_v37  ;;  %1631 = vmatprep.subr.bf16.mxu1 %v2055_v8 }
 0x1bc   : > { %1606 = vmatpush1.bf16.msra.mxu0 %v2375_v45  ;;  %1633 = vmatpush3.bf16.msra.mxu1 %v2407_v5 }
 0x1bd   : > { %1608 = vmatprep.subr.bf16.mxu0 %v2386_v49  ;;  %1634 = vmatprep.subr.bf16.mxu1 %v2055_v8 }
 0x1c0   : > { %1610 = vmatpush1.bf16.msra.mxu0 %v2393_v56  ;;  %1636 = vmatpush3.bf16.msra.mxu1 %v2417_v16 }
 0x1c1   : > { %1612 = vmatprep.subr.bf16.mxu0 %v2400_v60  ;;  %1637 = vmatprep.subr.bf16.mxu1 %v2055_v8 }
 0x1c4   : > { %1614 = vmatpush1.bf16.msra.mxu0 %v2404_v2  ;;  %1639 = vmatpush3.bf16.msra.mxu1 %v2425_v22 }
 0x1c5   : > { %1616 = vmatprep.subr.bf16.mxu0 %v2410_v6  ;;  %1640 = vmatprep.subr.bf16.mxu1 %v2055_v8 }
 0x1c8   : > { %1618 = vmatpush1.bf16.msra.mxu0 %v2414_v14  ;;  %1642 = vmatpush3.bf16.msra.mxu1 %v2431_v27 }
 0x1c9   : > { %1644 = vmatprep.subr.bf16.mxu0 %v2317_v4  ;;  %1675 = vmatprep.subr.bf16.mxu1 %v2055_v8  ;;  %v895_v4 = vsel %vm894_vm4, 1, %v2058_v15 }
 0x1ca   : > { %897 = vperm.xlu1 %1821, %v895_v4  }
 0x1ce   : > { %1080 = vperm.xlu1 %1821, %v1078_v13  }
 0x27e   : > { %v612_v20 = vpop.f32.mrb[2].mxu0  ;;  %v683_v21 = vpop.f32.mrb[2].mxu1 }
 0x27f   : > { %v687_v24 = vadd.f32 %v612_v20, %v543_v19  ;;  %v614_v28 = vpop.f32.mrb[3].mxu0  ;;  %v1404_v29 = vpop.f32.mrb[3].mxu1  ;;  %v701_v39 = vadd.f32 %v2479_v46, %v683_v21 }
 0x280   : > { %v694_v32 = vadd.f32 %v614_v28, %v544_v26 }
 0x281   : > { %v1248_v30 = vmul.f32 -1.442695, %v687_v24 }
 0x282   : > { %v1249_v33 = vmul.f32 -1.442695, %v694_v32 }
 0x283   : > { %1832 = vpow2.f32 %v1248_v30  ;;  %v912_v30 = vld [vmem:[%s909_s11 + $0x10] sm:$0xff] }
 0x284   : > { %1834 = vpow2.f32 %v1249_v33 }
 0x28d   : > { %v1833_v48 = vpop.eup %1832 }
 0x28e   : > { %v691_v35 = vadd.f32 1.0, %v1833_v48  ;;  %v1835_v15 = vpop.eup %1834 }
 0x28f   : > { %v698_v38 = vadd.f32 1.0, %v1835_v15 }
 0x290   : > { %1836 = vrcp.f32 %v691_v35 }
 0x291   : > { %1838 = vrcp.f32 %v698_v38 }
 0x29a   : > { %v1837_v40 = vpop.eup %1836 }
 0x29b   : > { %v702_v42 = vmul.f32 %v1837_v40, %v701_v39  ;;  %v1839_v44 = vpop.eup %1838 }
 0x29c   : > { %v705_v50 = vsub.f32 1.0, %v1839_v44  ;;  %v707_v54 = vmul.f32 %v1839_v44, %v2484_v3 }
 0x29d   : > { %v703_v43 = vadd.f32 %v702_v42, %v545_v41 }
 0x29f   : > { %1840 = vtanh.f32 %v703_v43 }
 0x2a9   : > { %v1841_v51 = vpop.eup %1840 }
 0x2aa   : > { %v706_v53 = vmul.f32 %v1841_v51, %v705_v50 }
 0x2ac   : > { %v708_v55 = vadd.f32 %v707_v54, %v706_v53 }
 0x2ae   : > { %v2541_v57 = vsel %vm715_vm6, %v708_v55, %v2484_v3  ;;  %v911_v3 = vld [vmem:[%s909_s11 + $0x8] sm:$0xff] }
 0x2af   : > { %795 = vmatmul.mubr.f32.vlgmr.msra.gmra.mrb[4].mxu0 %v2541_v57  ;;  %1438 = vmatmul.mubr.f32.vlgmr.msra.gmra.mrb[4].mxu1 %v2541_v57 }
 0x2b0   : > { %1646 = vmatpush1.bf16.msra.mxu0 %v2327_v10  ;;  %1677 = vmatpush3.bf16.msra.mxu1 %v2360_v31 }
 0x2b1   : > { %1648 = vmatprep.subr.bf16.mxu0 %v2329_v11  ;;  %1678 = vmatprep.subr.bf16.mxu1 %v2055_v8 }
 0x2b2   : > { %977 = vmatprep.mubr.f32.mxu0 %v2056_v9  ;;  %1472 = vmatprep.mubr.msk.f32.mxu1 %vm2057_vm0, %v2056_v9  ;;  %v727_v9 = vld [vmem:[%s726_s2] sm:$0xff] }
 0x2b4   : > { %1650 = vmatpush1.bf16.msra.mxu0 %v2339_v17  ;;  %1680 = vmatpush3.bf16.msra.mxu1 %v2368_v36 }
 0x2b5   : > { %1652 = vmatprep.subr.bf16.mxu0 %v2345_v18  ;;  %1681 = vmatprep.subr.bf16.mxu1 %v2055_v8  ;;  %v728_v18 = vld [vmem:[%s726_s2 + $0x8] sm:$0xff] }
 0x2b8   : > { %1654 = vmatpush1.bf16.msra.mxu0 %v2355_v23  ;;  %1683 = vmatpush3.bf16.msra.mxu1 %v2378_v47 }
 0x2b9   : > { %1656 = vmatprep.subr.bf16.mxu0 %v2358_v25  ;;  %1684 = vmatprep.subr.bf16.mxu1 %v2055_v8 }
 0x2bc   : > { %1658 = vmatpush1.bf16.msra.mxu0 %v2365_v34  ;;  %1686 = vmatpush3.bf16.msra.mxu1 %v2396_v58  ;;  %v729_v58 = vld [vmem:[%s726_s2 + $0x10] sm:$0xff] }
 0x2bd   : > { %1660 = vmatprep.subr.bf16.mxu0 %v2371_v37  ;;  %1687 = vmatprep.subr.bf16.mxu1 %v2055_v8 }
 0x2c0   : > { %1662 = vmatpush1.bf16.msra.mxu0 %v2375_v45  ;;  %1689 = vmatpush3.bf16.msra.mxu1 %v2407_v5 }
 0x2c1   : > { %1664 = vmatprep.subr.bf16.mxu0 %v2386_v49  ;;  %1690 = vmatprep.subr.bf16.mxu1 %v2055_v8 }
 0x2c4   : > { %1666 = vmatpush1.bf16.msra.mxu0 %v2393_v56  ;;  %1692 = vmatpush3.bf16.msra.mxu1 %v2417_v16  ;;  %v898_v16 = vpop.permute.xlu1 %897 }
 0x2c5   : > { %1668 = vmatprep.subr.bf16.mxu0 %v2400_v60  ;;  %1693 = vmatprep.subr.bf16.mxu1 %v2055_v8  ;;  %vm899_vm7 = vcmp.eq.s32.totalorder %v898_v16, 1 }
 0x2c8   : > { %1670 = vmatpush1.bf16.msra.mxu0 %v2404_v2  ;;  %1695 = vmatpush3.bf16.msra.mxu1 %v2425_v22  ;;  %v1081_v38 = vpop.permute.xlu1 %1080 }
 0x2c9   : > { %1672 = vmatprep.subr.bf16.mxu0 %v2410_v6  ;;  %1696 = vmatprep.subr.bf16.mxu1 %v2055_v8  ;;  %vm1082_vm8 = vcmp.eq.s32.totalorder %v1081_v38, 1 }
 0x2cc   : > { %1674 = vmatpush1.bf16.msra.mxu0 %v2414_v14  ;;  %1698 = vmatpush3.bf16.msra.mxu1 %v2431_v27 }
 0x382   : > { %v796_v10 = vpop.f32.mrb[4].mxu0  ;;  %v867_v11 = vpop.f32.mrb[4].mxu1 }
 0x383   : > { %v871_v17 = vadd.f32 %v796_v10, %v727_v9  ;;  %v798_v23 = vpop.f32.mrb[5].mxu0  ;;  %v1439_v25 = vpop.f32.mrb[5].mxu1  ;;  %v885_v49 = vadd.f32 %v2479_v46, %v867_v11 }
 0x384   : > { %v878_v34 = vadd.f32 %v798_v23, %v728_v18 }
 0x385   : > { %v1252_v31 = vmul.f32 -1.442695, %v871_v17 }
 0x386   : > { %v1253_v36 = vmul.f32 -1.442695, %v878_v34 }
 0x387   : > { %1842 = vpow2.f32 %v1252_v31 }
 0x388   : > { %1844 = vpow2.f32 %v1253_v36 }
 0x391   : > { %v1843_v8 = vpop.eup %1842 }
 0x392   : > { %v875_v37 = vadd.f32 1.0, %v1843_v8  ;;  %v1845_v45 = vpop.eup %1844 }
 0x393   : > { %v882_v47 = vadd.f32 1.0, %v1845_v45 }
 0x394   : > { %1846 = vrcp.f32 %v875_v37 }
 0x395   : > { %1848 = vrcp.f32 %v882_v47 }
 0x39e   : > { %v1847_v56 = vpop.eup %1846 }
 0x39f   : > { %v886_v60 = vmul.f32 %v1847_v56, %v885_v49  ;;  %v1849_v5 = vpop.eup %1848 }
 0x3a0   : > { %v889_v6 = vsub.f32 1.0, %v1849_v5  ;;  %v891_v27 = vmul.f32 %v1849_v5, %v2541_v57 }
 0x3a1   : > { %v887_v2 = vadd.f32 %v886_v60, %v729_v58 }
 0x3a3   : > { %1850 = vtanh.f32 %v887_v2 }
 0x3ad   : > { %v1851_v14 = vpop.eup %1850 }
 0x3ae   : > { %v890_v22 = vmul.f32 %v1851_v14, %v889_v6 }
 0x3b0   : > { %v892_v59 = vadd.f32 %v891_v27, %v890_v22 }
 0x3b2   : > { %v900_v61 = vsel %vm899_vm7, %v892_v59, %v2541_v57 }
 0x3b3   : > { %978 = vmatmul.mubr.f32.vlgmr.msra.gmra.mrb[6].mxu0 %v900_v61  ;;  %1473 = vmatmul.mubr.f32.vlgmr.msra.gmra.mrb[6].mxu1 %v900_v61 }
 0x486   : > { %v979_v63 = vpop.f32.mrb[6].mxu0  ;;  %v1050_v0 = vpop.f32.mrb[6].mxu1 }
 0x487   : > { %v1054_v1 = vadd.f32 %v979_v63, %v910_v62  ;;  %v981_v7 = vpop.f32.mrb[7].mxu0  ;;  %v1474_v4 = vpop.f32.mrb[7].mxu1  ;;  %v1068_v28 = vadd.f32 %v2479_v46, %v1050_v0 }
 0x488   : > { %v1061_v13 = vadd.f32 %v981_v7, %v911_v3 }
 0x489   : > { %v1256_v12 = vmul.f32 -1.442695, %v1054_v1 }
 0x48a   : > { %v1257_v19 = vmul.f32 -1.442695, %v1061_v13 }
 0x48b   : > { %1852 = vpow2.f32 %v1256_v12 }
 0x48c   : > { %1854 = vpow2.f32 %v1257_v19 }
 0x495   : > { %v1853_v20 = vpop.eup %1852 }
 0x496   : > { %v1058_v21 = vadd.f32 1.0, %v1853_v20  ;;  %v1855_v24 = vpop.eup %1854 }
 0x497   : > { %v1065_v26 = vadd.f32 1.0, %v1855_v24 }
 0x498   : > { %1856 = vrcp.f32 %v1058_v21 }
 0x499   : > { %1858 = vrcp.f32 %v1065_v26 }
 0x4a2   : > { %v1857_v29 = vpop.eup %1856 }
 0x4a3   : > { %v1069_v32 = vmul.f32 %v1857_v29, %v1068_v28  ;;  %v1859_v48 = vpop.eup %1858 }
 0x4a4   : > { %v1072_v35 = vsub.f32 1.0, %v1859_v48  ;;  %v1074_v40 = vmul.f32 %v1859_v48, %v900_v61 }
 0x4a5   : > { %v1070_v33 = vadd.f32 %v1069_v32, %v912_v30 }
 0x4a7   : > { %1860 = vtanh.f32 %v1070_v33 }
 0x4b1   : > { %v1861_v15 = vpop.eup %1860  ;;  %1088 = sbr.rel (%p1258_p11) target bundleno = 1216 (0x4c0), region = 52 }
 0x4b2   : > { %v1073_v39 = vmul.f32 %v1861_v15, %v1072_v35 }
 0x4b4   : > { %v1075_v41 = vadd.f32 %v1074_v40, %v1073_v39 }
 0x4b6   : > { %v1083_v42 = vsel %vm1082_vm8, %v1075_v41, %v900_v61 }
 0x4b7   : > { %1084 = vst [vmem:[#allocation2] sm:$0xff] %v1083_v42 }
 0x4be   : > { %v1089_v46 = vld [vmem:[#allocation2] sm:$0xff] }
 0x4bf   : > { %1090 = vst [vmem:[%s278_s8] sm:$0xff] %v1089_v46 }
 0x4c0 PF: > { %s2700_s6 = sld [smem:[#allocation15_spill]]  ;;  %s1260_s10 = sshll.u32 %s2036_s22, 7 }
 0x4c1   : > { %s2701_s18 = sld [smem:[#allocation20_spill]]  ;;  %s1105_s5 = sshll.u32 %s278_s8, 4  ;;  %s1106_s5 = int_to_ptr.vmem [resolvable:$true] %s1105_s5 }
 0x4c2   : > { %s1092_s13 = scalar_lea.sflag [#allocation5], %s276_s1  ;;  %s1922_s7 = scalar_lea.vmem %s1106_s5, 128 }
 0x4c3   : > { %p1923_p12 = scmp.ne.s32.totalorder %s1106_s5, %s1922_s7  ;;  %s2059_s4 = smov [#allocation8]  }
 0x4c4   : > { %s1926_s12 = sshll.u32 %s2059_s4, 4  ;;  %s1927_s12 = int_to_ptr.vmem [resolvable:$false] %s1926_s12 }
 0x4c5   : > { %s1928_s28 = scalar_lea.vmem %s1927_s12, 256  ;;  %p1929_p13 = scmp.lt.s32.totalorder %s1106_s5, %s1927_s12 }
 0x4c6   : > { %p2703_p0 = scmp.ne.s32.totalorder %s2700_s6, 0  ;;  %p1930_p4 = scmp.lt.s32.totalorder %s1928_s28, %s1922_s7 }
 0x4c7   : > { %s2702_s27 = smov %s2701_s18  ;;  %s2594_s23 = scalar_lea.hbm %s2701_s18, %s1260_s10 }
 0x4c8   : > { %p1924_p2 = pnand %p1923_p12, %p2703_p0  ;;  %p1931_p8 = por %p1930_p4, %p1929_p13 }
 0x4ca   : > { %p1925_p6 = pneg %p1924_p2 }
 0x4cc   : > { %p1932_p3 = pnand %p1931_p8, %p1925_p6 }
 0x4ce   : > { %1935 = shalt.err (!%p1932_p3)
}
 0x4cf   : > { %s1936_s22 = scalar_lea.hbm %s2594_s23, 128  ;;  %s1940_s8 = scalar_lea.hbm %s2702_s27, 256 }
 0x4d0   : > { %p1937_p1 = scmp.ne.s32.totalorder %s2594_s23, %s1936_s22  ;;  %p1941_p10 = scmp.lt.u32.totalorder %s2594_s23, %s2702_s27 }
 0x4d1   : > { %p1942_p9 = scmp.lt.u32.totalorder %s1940_s8, %s1936_s22  ;;  %p1944_p12 = scmp.lt.u32.totalorder %s1936_s22, %s2594_s23 }
 0x4d2   : > { %p1938_p7 = pnand %p1937_p1, %p2703_p0 }
 0x4d3   : > { %p1943_p11 = por %p1942_p9, %p1941_p10 }
 0x4d4   : > { %p1939_p5 = pneg %p1938_p7 }
 0x4d5   : > { %p1945_p2 = por %p1944_p12, %p1943_p11 }
 0x4d7   : > { %p1946_p6 = pnand %p1945_p2, %p1939_p5 }
 0x4d9   : > { %1949 = shalt.err (!%p1946_p6)
}
 0x4da   : > { %1708 = dma.vmem_to_hbm [thread:$0]  (%p2703_p0), %s1106_s5, 128, %s2594_s23, %s1092_s13  }
 0x4db PF: > { %s2704_s11 = sld [smem:[#allocation12_spill]]  ;;  %s2705_s10 = sld [smem:[#allocation16_spill]] }
 0x4dc   : > { %p1723_p13 = scmp.ge.s32.totalorder %s2048_s25, 2 }
 0x4e1   : > { %s1117_s15 = sand.u32 1, %s2704_s11   ;;  %p2706_p4 = scmp.ne.s32.totalorder %s2705_s10, 0 }
 0x4e2   : > { %s1118_s14 = scalar_lea.sflag [#allocation5], %s1117_s15 }
 0x4e3   : > { %p1719_p8 = pnand %p1723_p13, %p2706_p4 }
 0x4e5   : > { %2003 = dma.done.wait (!%p1719_p8), %s1118_s14, 128  }
 0x4e6   : > { %2005 = vsyncadd (!%p1719_p8), %s1118_s14, 4294967168  ;;  %s21_s25 = sadd.s32 1, %s2048_s25   ;;  %s2707_s21 = sld [smem:[#allocation14_spill]] }
 0x4e7   : > { %p18_p3 = scmp.ge.s32.totalorder %s21_s25, 6   ;;  %s2708_s6 = sld [smem:[#allocation17_spill]] }
 0x4e8   : > { %s2709_s15 = smov %s2012_s16  ;;  %s2710_s16 = smov %s2016_s17 }
 0x4e9   : > { %s2711_s17 = smov %s2239_s30  ;;  %s2712_s18 = smov %s2024_s19 }
 0x4ea   : > { %s2713_s19 = smov %s2028_s20  ;;  %s2714_s20 = smov %s2242_s9 }
 0x4eb   : > { %s2715_s22 = smov %s2044_s24  ;;  %s2716_s23 = smov %s2719_s26 }
 0x4ec   :  { %20 = sbr.rel (!%p18_p3) target bundleno = 14 (0xe), region = 101 }
 0x4ed   : > { %s2717_s24 = smov %s2708_s6 }
 0x4f3   :  { %1123 = vsyncpa [#allocation4], 1 }
 0x4f4   :  { %1125 = vsyncpa [#allocation4 + $0x1], 1 }
 0x4f5   :  { %1126 = vsyncpa [#allocation7], 1 }
 0x4f6   :  { %1127 = vsyncpa [#allocation5], 1 }
 0x4f7   :  { %1129 = vsyncpa [#allocation5 + $0x1], 1 }

// kernel: tpu_custom_call.1
= control target key start
LH: loop header
LB: loop body
LE: loop exit
PB: predicated region body
PF: predicated region fallthrough
CT: control target
= control target key end

     0   :  { %s2756_s0 = inlined_call_operand.hbm [shape: f32[2,8,8,384], index: 0, kind: input, shape index: {}]   ;;  %s2757_s1 = inlined_call_operand.vmem [shape: s32[8,1], index: 1, kind: input, shape index: {}]   ;;  %s2758_s2 = inlined_call_operand.hbm [shape: f32[2,128,384], index: 2, kind: input, shape index: {}]   ;;  %s2759_s3 = inlined_call_operand.vmem [shape: f32[2,1,128], index: 3, kind: input, shape index: {}]   ;;  %s2760_s4 = inlined_call_operand.hbm [shape: f32[2,8,128], index: 4, kind: output, shape index: {}]  }
   0x1   :  { %2773 = sst [smem:[#allocation17_spill]] %s2756_s0 }
   0x2   :  { %9 = vsyncpa [#allocation4], 0 }
   0x3   :  { %11 = vsyncpa [#allocation4 + $0x1], 0 }
   0x4   :  { %12 = vsyncpa [#allocation7], 0 }
   0x5   :  { %14 = vsyncpa [#allocation7 + $0x1], 0 }
   0x6   :  { %15 = vsyncpa [#allocation5], 0 }
   0x7   :  { %17 = vsyncpa [#allocation5 + $0x1], 0  ;;  %s2110_s15 = smov 0   ;;  %s2112_s16 = smov 0  }
   0x8   :  { %s2114_s17 = smov 0   ;;  %s2116_s18 = smov 0  }
   0x9   :  { %s2118_s19 = smov 0   ;;  %s2120_s20 = smov 0  }
   0xa   :  { %s2122_s21 = smov 0   ;;  %s2124_s22 = smov 0  }
   0xb   :  { %s2126_s23 = smov 0   ;;  %s2128_s24 = smov 0  }
   0xc   :  { %s2130_s25 = smov 0  }
   0xd LB: > { %2774 = sst [smem:[#allocation12_spill]] %s2065_s23  ;;  %s2761_s26 = sadd.s32 4294967295, %s2073_s25   ;;  %s2073_s25 = sphi %s2130_s25, %s23_s25   ;;  %s2069_s24 = sphi %s2128_s24, %s2803_s24   ;;  %s2065_s23 = sphi %s2126_s23, %s2802_s23   ;;  %s2061_s22 = sphi %s2124_s22, %s2801_s22   ;;  %s2057_s21 = sphi %s2122_s21, %s2800_s21   ;;  %s2053_s20 = sphi %s2120_s20, %s2809_s20   ;;  %s2049_s19 = sphi %s2118_s19, %s2808_s19   ;;  %s2045_s18 = sphi %s2116_s18, %s2807_s18   ;;  %s2041_s17 = sphi %s2114_s17, %s2806_s17   ;;  %s2037_s16 = sphi %s2112_s16, %s2805_s16   ;;  %s2033_s15 = sphi %s2110_s15, %s2804_s15  }
   0xe   : > { %2775 = sst [smem:[#allocation13_spill]] %s2069_s24  ;;  %s32_s27 = sadd.s32 1, %s2065_s23 }
   0xf   : > { %p33_p0 = scmp.ge.s32.totalorder %s32_s27, 2  ;;  %s35_s28 = sadd.s32 1, %s2069_s24 }
  0x10   : > { %s1253_s29 = sshll.u32 %s2065_s23, 1  ;;  %s52_s30 = sadd.s32 1, %s2053_s20 }
  0x11   : > { %s2811_s27 = smov (%p33_p0, %s32_s27), 0  ;;  %s2813_s28 = smov (!%p33_p0, %s35_s28), %s2069_s24 }
  0x12   : > { %2776 = sst [smem:[#allocation14_spill]] %s2811_s27  ;;  %s40_s5 = ssub.s32 1, %s1253_s29 }
  0x13   : > { %s1254_s6 = sshll.u32 %s2811_s27, 1  ;;  %p37_p1 = scmp.ge.s32.totalorder %s2813_s28, 2 }
  0x14   : > { %s41_s7 = smul.u32 %s2069_s24, %s40_s5  ;;  %s44_s8 = ssub.s32 1, %s1254_s6 }
  0x15   : > { %p59_p2 = scmp.ne.s32.totalorder %s2053_s20, %s2049_s19  ;;  %s2815_s28 = smov (%p37_p1, %s2813_s28), 0 }
  0x16   : > { %2777 = sst [smem:[#allocation15_spill]] %s2815_s28  ;;  %s42_s9 = sadd.s32 %s2065_s23, %s41_s7 }
  0x17   : > { %p2766_p3 = scmp.eq.s32.totalorder %s2073_s25, 0  ;;  %s45_s10 = smul.u32 %s44_s8, %s2815_s28 }
  0x18   : > { %s2184_s11 = ssub.s32 %s2069_s24, %s2815_s28  ;;  %p65_p5 = scmp.ne.s32.totalorder %s2049_s19, %s2045_s18 }
  0x19   : > { %p2188_p4 = por %p2766_p3, %p59_p2  ;;  %s46_s13 = sadd.s32 %s45_s10, %s2811_s27 }
  0x1a   : > { %p2197_p6 = scmp.eq.s32.totalorder %s2761_s26, 0  ;;  %s48_s29 = ssub.s32 %s42_s9, %s46_s13 }
  0x1b   : > { %s49_s5 = sor.u32 %s48_s29, %s2184_s11  ;;  %p2765_p10 = scmp.lt.s32.totalorder %s2073_s25, 4 }
  0x1c   : > { %p2205_p8 = por %p2197_p6, %p65_p5  ;;  %p50_p9 = scmp.eq.s32.totalorder %s49_s5, 0 }
  0x1d   : > { %s191_s7 = sand.u32 1, %s2053_s20   ;;  %s1725_s10 = smul.u32 12, %s42_s9 }
  0x1e   : > { %s2780_s6 = scalar_select %p2205_p8, 1, 0 }
  0x1f   : > { %s2212_s8 = scalar_select %p50_p9, %s2053_s20, %s52_s30  }
  0x20   : > { %s1724_s18 = smul.u32 96, %s191_s7  ;;  %p2218_p11 = pnand %p2765_p10, %p2188_p4 }
  0x21   : > { %2781 = sst [smem:[#allocation16_spill]] %s2212_s8  ;;  %s1726_s13 = smul.u32 24, %s2069_s24 }
  0x22   : > { %s195_s29 = scalar_lea.vmem [#allocation3], %s1724_s18  ;;  %s2783_s0 = sld [smem:[#allocation17_spill]] }
  0x23   : > { %s209_s28 = sshll.u32 %s195_s29, 4  ;;  %s206_s27 = sadd.s32 %s1726_s13, %s1725_s10  ;;  %s2223_s28 = int_to_ptr.vmem [resolvable:$true] %s209_s28 }
  0x24   : > { %s1260_s5 = sshll.u32 %s206_s27, 7  ;;  %s2230_s9 = scalar_lea.sflag [#allocation4], %s191_s7 }
  0x25   : > { %p1889_p13 = pneg %p2218_p11 }
  0x28   : > { %s2228_s8 = scalar_lea.hbm %s2783_s0, %s1260_s5  ;;  %s1892_s23 = scalar_lea.hbm %s2783_s0, 6144 }
  0x29   : > { %s1887_s12 = scalar_lea.hbm %s2228_s8, 1536  ;;  %p1893_p2 = scmp.lt.u32.totalorder %s2228_s8, %s2783_s0 }
  0x2a   : > { %p1888_p12 = scmp.ne.s32.totalorder %s2228_s8, %s1887_s12  ;;  %p1894_p4 = scmp.lt.u32.totalorder %s1892_s23, %s1887_s12 }
  0x2b   : > { %p1896_p9 = scmp.lt.u32.totalorder %s1887_s12, %s2228_s8 }
  0x2c   : > { %p1890_p0 = pnand %p1889_p13, %p1888_p12  ;;  %p1895_p5 = por %p1894_p4, %p1893_p2 }
  0x2e   : > { %p1891_p1 = pneg %p1890_p0  ;;  %p1897_p10 = por %p1896_p9, %p1895_p5 }
  0x30   : > { %p1898_p3 = pnand %p1897_p10, %p1891_p1 }
  0x32   : > { %1901 = shalt.err (!%p1898_p3)
}
  0x33   : > { %s1902_s7 = scalar_lea.vmem %s2223_s28, 1536  ;;  %s2075_s29 = smov [#allocation3]  }
  0x34   : > { %p1903_p12 = scmp.ne.s32.totalorder %s2223_s28, %s1902_s7  ;;  %s1907_s5 = sshll.u32 %s2075_s29, 4  ;;  %s1908_s5 = int_to_ptr.vmem [resolvable:$false] %s1907_s5 }
  0x35   : > { %s1909_s30 = scalar_lea.vmem %s1908_s5, 3072  ;;  %p1910_p8 = scmp.lt.s32.totalorder %s2223_s28, %s1908_s5 }
  0x36   : > { %p1905_p0 = pnand %p1903_p12, %p1889_p13  ;;  %p1911_p2 = scmp.lt.s32.totalorder %s1909_s30, %s1902_s7 }
  0x38   : > { %p1906_p7 = pneg %p1905_p0  ;;  %p1912_p4 = por %p1911_p2, %p1910_p8 }
  0x3a   : > { %p1913_p5 = pnand %p1912_p4, %p1906_p7 }
  0x3c   : > { %1916 = shalt.err (!%p1913_p5)
}
  0x3d   : > { %s2768_s12 = smov 384   ;;  %s2769_s27 = smov 24  }
  0x3e   : > { %1740 = dma.hbm_to_vmem [thread:$0]  (!%p2218_p11), %s2228_s8, 1536, %s2223_s28, %s2230_s9, %s2768_s12, %s2768_s12, %s2769_s27  }
  0x3f   : > { %p1262_p3 = scmp.ge.s32.totalorder %s2073_s25, 1  ;;  %p244_p7 = scmp.lt.s32.totalorder %s2073_s25, 5 }
  0x40   : > { %s1252_s23 = sadd.s32 4294967294, %s2073_s25   ;;  %s99_s10 = sadd.s32 1, %s2041_s17 }
  0x41   : > { %p2263_p8 = pnand %p1262_p3, %p244_p7  ;;  %p106_p10 = scmp.ne.s32.totalorder %s2041_s17, %s2037_s16 }
  0x42   : > { %p2785_p13 = scmp.eq.s32.totalorder %s2184_s11, 0  ;;  %p2786_p1 = scmp.eq.s32.totalorder %s2073_s25, 0 }
  0x43   : > { %p112_p12 = scmp.ne.s32.totalorder %s2037_s16, %s2033_s15  ;;  %s2787_s26 = sadd.s32 4294967295, %s2073_s25  }
  0x44   : > { %s2274_s13 = scalar_select %p2785_p13, %s2041_s17, %s99_s10  }
  0x45   : > { %p108_p9 = por %p106_p10, %p2786_p1  ;;  %p162_p0 = scmp.eq.s32.totalorder %s2787_s26, 3 }
  0x46   : > { %p168_p11 = scmp.eq.s32.totalorder %s1252_s23, 3  ;;  %p2284_p2 = por %p112_p12, %p2197_p6 }
  0x47   : > { %s219_s8 = sand.u32 1, %s2041_s17   ;;  %p2289_p4 = por %p162_p0, %p106_p10 }
  0x48   : > { %s2788_s28 = scalar_select %p2284_p2, 1, 0 }
  0x49   : > { %s2789_s9 = scalar_select %p2289_p4, 1, 0 }
  0x4a   : > { %p2293_p5 = por %p168_p11, %p112_p12  ;;  %s1727_s7 = smul.u32 384, %s219_s8 }
  0x4b   : > { %s1728_s29 = smul.u32 6144, %s2069_s24  ;;  %p2791_p3 = scmp.lt.s32.totalorder %s2073_s25, 4 }
  0x4c   : > { %s2790_s11 = scalar_select %p2293_p5, 1, 0 }
  0x4d   : > { %p2300_p7 = pnand %p2791_p3, %p108_p9  ;;  %s2307_s23 = scalar_lea.hbm %s2758_s2, %s1728_s29 }
  0x4e   : > { %s223_s10 = scalar_lea.vmem [#allocation6], %s1727_s7  ;;  %s2311_s12 = scalar_lea.sflag [#allocation7], %s219_s8 }
  0x4f   : > { %s230_s26 = sshll.u32 %s223_s10, 4  ;;  %s1917_s27 = scalar_lea.hbm %s2307_s23, 6144  ;;  %s2309_s26 = int_to_ptr.vmem [resolvable:$true] %s230_s26 }
  0x50   : > { %p1918_p6 = scmp.ne.s32.totalorder %s2307_s23, %s1917_s27  ;;  %p1919_p10 = pneg %p2300_p7 }
  0x51   : > { %s1922_s30 = scalar_lea.hbm %s2758_s2, 12288  ;;  %p1923_p9 = scmp.lt.u32.totalorder %s2307_s23, %s2758_s2 }
  0x52   : > { %p1920_p13 = pnand %p1919_p10, %p1918_p6  ;;  %p1924_p12 = scmp.lt.u32.totalorder %s1922_s30, %s1917_s27 }
  0x53   : > { %p1926_p11 = scmp.lt.u32.totalorder %s1917_s27, %s2307_s23 }
  0x54   : > { %p1921_p1 = pneg %p1920_p13  ;;  %p1925_p0 = por %p1924_p12, %p1923_p9 }
  0x56   : > { %p1927_p3 = por %p1926_p11, %p1925_p0 }
  0x58   : > { %p1928_p5 = pnand %p1927_p3, %p1921_p1 }
  0x5a   : > { %1931 = shalt.err (!%p1928_p5)
}
  0x5b   : > { %s1932_s8 = scalar_lea.vmem %s2309_s26, 6144  ;;  %s2078_s7 = smov [#allocation6]  }
  0x5c   : > { %p1933_p6 = scmp.ne.s32.totalorder %s2309_s26, %s1932_s8  ;;  %s1937_s10 = sshll.u32 %s2078_s7, 4  ;;  %s1938_s10 = int_to_ptr.vmem [resolvable:$false] %s1937_s10 }
  0x5d   : > { %s1939_s0 = scalar_lea.vmem %s1938_s10, 12288  ;;  %p1940_p2 = scmp.lt.s32.totalorder %s2309_s26, %s1938_s10 }
  0x5e   : > { %p1935_p13 = pnand %p1933_p6, %p1919_p10  ;;  %p1941_p9 = scmp.lt.s32.totalorder %s1939_s0, %s1932_s8 }
  0x60   : > { %p1936_p4 = pneg %p1935_p13  ;;  %p1942_p12 = por %p1941_p9, %p1940_p2 }
  0x62   : > { %p1943_p0 = pnand %p1942_p12, %p1936_p4 }
  0x64   : > { %1946 = shalt.err (!%p1943_p0)
}
  0x65   : > { %s2793_s24 = smov 24   ;;  %s2794_s27 = smov 384  }
  0x66   : > { %1743 = dma.hbm_to_vmem [thread:$0]  (!%p2300_p7), %s2307_s23, 6144, %s2309_s26, %s2311_s12, %s2794_s27, %s2794_s27, %s2793_s24  }
  0x67   : > { %248 = sbr.rel (%p2263_p8) target bundleno = 1235 (0x4d3), region = 36  ;;  %s250_s29 = sand.u32 (!%p2263_p8), 1, %s2049_s19  }
  0x68   : > { %s1729_s14 = smul.u32 (!%p2263_p8), 96, %s250_s29  ;;  %s251_s30 = scalar_lea.sflag (!%p2263_p8), [#allocation4], %s250_s29 }
  0x69   : > { %p2795_p2 = scmp.ne.s32.totalorder (!%p2263_p8), %s2780_s6, 0 }
  0x6a   : > { %s2345_s8 = scalar_lea.vmem (!%p2263_p8), [#allocation3], %s1729_s14 }
  0x6e   : > { %2020 = dma.done.wait (%p2795_p2), %s251_s30, 1536  }
  0x6f   : > { %2022 = vsyncadd (%p2795_p2), %s251_s30, 4294965760  ;;  %s2352_s5 = sand.u32 1, %s2037_s16   ;;  %p2796_p8 = scmp.ne.s32.totalorder %s2788_s28, 0 }
  0x70   : > { %s1730_s12 = smul.u32 384, %s2352_s5  ;;  %s260_s18 = scalar_lea.sflag [#allocation7], %s2352_s5 }
  0x72   : > { %s2356_s23 = scalar_lea.vmem [#allocation6], %s1730_s12 }
  0x73   : > { %2024 = dma.done.wait (%p2796_p8), %s260_s18, 6144  }
  0x74   : > { %2026 = vsyncadd (%p2796_p8), %s260_s18, 4294961152  ;;  %s1263_s6 = sshll.u32 %s2352_s5, 3  ;;  %p301_p4 = scmp.lt.s32.totalorder %s2061_s22, 1 }
  0x75   : > { %s2371_s24 = scalar_lea.vmem [#allocation8], %s1263_s6  ;;  %p1264_p5 = scmp.ne.s32.totalorder %s2057_s21, 0 }
  0x76   : > { %s2365_s26 = scalar_select %p301_p4, %s2061_s22, 1 }
  0x77   : > { %307 = sbr.rel (%p1264_p5) target bundleno = 126 (0x7e), region = 48  ;;  %v2079_v0 = vmov (!%p1264_p5), 0.0  }
  0x78   : > { %s303_s0 = scalar_lea.vmem %s2759_s3, %s2365_s26  ;;  %308 = vst [vmem:[#allocation2] sm:$0xff] (!%p1264_p5), %v2079_v0 }
  0x7e PF: > { %v311_v1 = vld [vmem:[%s2356_s23 + $0x8] sm:$0xff]  ;;  %v314_v2 = vld [vmem:[%s2356_s23 + $0x20] sm:$0xff]  ;;  %v313_v5 = vld [vmem:[%s2356_s23 + $0x18] sm:$0xff]  ;;  %v2080_v8 = vmov 0.0|0.0   ;;  %v2081_v9 = vmov 0.0   ;;  %s2385_s28 = sshll.u32 %s2057_s21, 2 }
  0x7f   : > { %v310_v3 = vld [vmem:[%s2356_s23] sm:$0xff]  ;;  %v2377_v4 = vpack.c.bf16 %v314_v2, %v311_v1  ;;  %v317_v6 = vld [vmem:[%s2356_s23 + $0x38] sm:$0xff]  ;;  %v320_v7 = vld [vmem:[%s2356_s23 + $0x50] sm:$0xff]  ;;  %1532 = vmatprep.subr.bf16.mxu1 %v2080_v8  ;;  %437 = vmatprep.mubr.f32.mxu0 %v2081_v9  ;;  %s2388_s27 = ssub.s32 1, %s2061_s22  ;;  %vm2082_vm0 = vmmov 0   ;;  %v2083_v15 = vmov 0  }
  0x80   : > { %v2390_v10 = vpack.c.bf16 %v313_v5, %v310_v3  ;;  %v2392_v11 = vpack.c.bf16 %v320_v7, %v317_v6  ;;  %v316_v12 = vld [vmem:[%s2356_s23 + $0x30] sm:$0xff]  ;;  %v319_v13 = vld [vmem:[%s2356_s23 + $0x48] sm:$0xff]  ;;  %1392 = vmatprep.mubr.msk.f32.mxu1 %vm2082_vm0, %v2081_v9  ;;  %1845 = vset.pattern.permute.xlu0 %v2083_v15  ;;  %s364_s29 = ssub.s32 7, %s2385_s28  ;;  %v326_v16 = vld [vmem:[%s2356_s23 + $0x80] sm:$0xff]  ;;  %s550_s14 = sadd.s32 1, %s2385_s28 }
  0x81   : > { %v323_v14 = vld [vmem:[%s2356_s23 + $0x68] sm:$0xff]  ;;  %1501 = vmatprep.subr.bf16.mxu0 %v2377_v4  ;;  %1846 = vset.pattern.permute.xlu1 %v2083_v15  ;;  %v2406_v17 = vpack.c.bf16 %v319_v13, %v316_v12  ;;  %s363_s30 = smul.u32 %s2385_s28, %s2388_s27  ;;  %s554_s12 = ssub.s32 6, %s2385_s28  ;;  %v322_v19 = vld [vmem:[%s2356_s23 + $0x60] sm:$0xff]  ;;  %v325_v20 = vld [vmem:[%s2356_s23 + $0x78] sm:$0xff] }
  0x82   : > { %1503 = vmatpush1.bf16.msra.mxu0 %v2390_v10  ;;  %v2412_v18 = vpack.c.bf16 %v326_v16, %v323_v14  ;;  %s365_s18 = smul.u32 %s2061_s22, %s364_s29  ;;  %v329_v21 = vld [vmem:[%s2356_s23 + $0x98] sm:$0xff]  ;;  %v332_v22 = vld [vmem:[%s2356_s23 + $0xb0] sm:$0xff]  ;;  %v2426_v23 = vpack.c.bf16 %v325_v20, %v322_v19  ;;  %v331_v26 = vld [vmem:[%s2356_s23 + $0xa8] sm:$0xff]  ;;  %s734_s26 = sadd.s32 2, %s2385_s28 }
  0x83   : > { %1505 = vmatprep.subr.bf16.mxu0 %v2392_v11  ;;  %s2420_s6 = smul.u32 %s550_s14, %s2388_s27  ;;  %v328_v24 = vld [vmem:[%s2356_s23 + $0x90] sm:$0xff]  ;;  %v2430_v25 = vpack.c.bf16 %v332_v22, %v329_v21  ;;  %v315_v28 = vld [vmem:[%s2356_s23 + $0x28] sm:$0xff]  ;;  %v338_v30 = vld [vmem:[%s2356_s23 + $0xe0] sm:$0xff]  ;;  %s921_s14 = ssub.s32 4, %s2385_s28 }
  0x84   : > { %s2423_s7 = smul.u32 %s2061_s22, %s554_s12  ;;  %v312_v27 = vld [vmem:[%s2356_s23 + $0x10] sm:$0xff]  ;;  %v335_v29 = vld [vmem:[%s2356_s23 + $0xc8] sm:$0xff]  ;;  %v318_v32 = vld [vmem:[%s2356_s23 + $0x40] sm:$0xff]  ;;  %s366_s10 = sadd.s32 %s365_s18, %s363_s30  ;;  %v2444_v34 = vpack.c.bf16 %v331_v26, %v328_v24 }
  0x85   : > { %v2437_v31 = vpack.c.bf16 %v315_v28, %v312_v27  ;;  %v321_v33 = vld [vmem:[%s2356_s23 + $0x58] sm:$0xff]  ;;  %v334_v35 = vld [vmem:[%s2356_s23 + $0xc0] sm:$0xff]  ;;  %v2451_v37 = vpack.c.bf16 %v338_v30, %v335_v29  ;;  %v324_v39 = vld [vmem:[%s2356_s23 + $0x70] sm:$0xff]  ;;  %v542_v43 = vstv %s366_s10  ;;  %s918_s10 = sadd.s32 3, %s2385_s28  ;;  %p1283_p7 = scmp.ne.s32.totalorder %s2057_s21, 1 }
  0x86   : > { %1507 = vmatpush1.bf16.msra.mxu0 %v2406_v17  ;;  %s556_s29 = sadd.s32 %s2423_s7, %s2420_s6  ;;  %v2448_v36 = vpack.c.bf16 %v321_v33, %v318_v32  ;;  %v337_v38 = vld [vmem:[%s2356_s23 + $0xd8] sm:$0xff]  ;;  %v327_v40 = vld [vmem:[%s2356_s23 + $0x88] sm:$0xff]  ;;  %v344_v42 = vld [vmem:[%s2356_s23 + $0x110] sm:$0xff]  ;;  %s737_s7 = smul.u32 %s734_s26, %s2388_s27 }
  0x87   : > { %1509 = vmatprep.subr.bf16.mxu0 %v2412_v18  ;;  %1534 = vmatpush3.bf16.msra.mxu1 %v2437_v31  ;;  %v341_v41 = vld [vmem:[%s2356_s23 + $0xf8] sm:$0xff]  ;;  %v726_v44 = vstv %s556_s29  ;;  %v2460_v45 = vpack.c.bf16 %v337_v38, %v334_v35  ;;  %v340_v46 = vld [vmem:[%s2356_s23 + $0xf0] sm:$0xff]  ;;  %v2464_v47 = vpack.c.bf16 %v327_v40, %v324_v39  ;;  %v343_v50 = vld [vmem:[%s2356_s23 + $0x108] sm:$0xff]  ;;  %s920_s30 = smul.u32 %s918_s10, %s2388_s27  ;;  %s1271_s6 = sshll.u32 %s2061_s22, 1 }
  0x88   : > { %1535 = vmatprep.subr.bf16.mxu1 %v2080_v8  ;;  %v2469_v48 = vld [vmem:[%s2757_s1] sm:$0xff]  ;;  %v2472_v49 = vpack.c.bf16 %v344_v42, %v341_v41  ;;  %v330_v51 = vld [vmem:[%s2356_s23 + $0xa0] sm:$0xff]  ;;  %v347_v53 = vld [vmem:[%s2356_s23 + $0x128] sm:$0xff]  ;;  %v2484_v56 = vpack.c.bf16 %v343_v50, %v340_v46  ;;  %s552_s26 = sadd.s32 %s1271_s6, %s2388_s27 }
  0x89   : > { %v333_v52 = vld [vmem:[%s2356_s23 + $0xb8] sm:$0xff]  ;;  %vm543_vm1 = vcmp.lt.s32.totalorder %v542_v43, %v2469_v48  ;;  %vm727_vm2 = vcmp.lt.s32.totalorder %v726_v44, %v2469_v48  ;;  %v350_v54 = vld [vmem:[%s2356_s23 + $0x140] sm:$0xff]  ;;  %v336_v62 = vld [vmem:[%s2356_s23 + $0xd0] sm:$0xff] }
  0x8a   : > { %1511 = vmatpush1.bf16.msra.mxu0 %v2426_v23  ;;  %v544_v55 = vsel %vm543_vm1, 1, %v2083_v15  ;;  %v346_v57 = vld [vmem:[%s2356_s23 + $0x120] sm:$0xff]  ;;  %v2488_v58 = vpack.c.bf16 %v333_v52, %v330_v51  ;;  %v728_v59 = vsel %vm727_vm2, 1, %v2083_v15  ;;  %v2492_v60 = vpack.c.bf16 %v350_v54, %v347_v53  ;;  %v349_v61 = vld [vmem:[%s2356_s23 + $0x138] sm:$0xff]  ;;  %v339_v63 = vld [vmem:[%s2356_s23 + $0xe8] sm:$0xff] }
  0x8b   : > { %1513 = vmatprep.subr.bf16.mxu0 %v2430_v25  ;;  %1537 = vmatpush3.bf16.msra.mxu1 %v2448_v36  ;;  %v353_v0 = vld [vmem:[%s2356_s23 + $0x158] sm:$0xff]  ;;  %v356_v1 = vld [vmem:[%s2356_s23 + $0x170] sm:$0xff]  ;;  %v2501_v2 = vpack.c.bf16 %v349_v61, %v346_v57  ;;  %v2505_v5 = vpack.c.bf16 %v339_v63, %v336_v62  ;;  %v355_v7 = vld [vmem:[%s2356_s23 + $0x168] sm:$0xff] }
  0x8c   : > { %1538 = vmatprep.subr.bf16.mxu1 %v2080_v8  ;;  %546 = vperm.xlu0 %1845, %v544_v55   ;;  %v352_v3 = vld [vmem:[%s2356_s23 + $0x150] sm:$0xff]  ;;  %v2508_v6 = vpack.c.bf16 %v356_v1, %v353_v0  ;;  %v342_v12 = vld [vmem:[%s2356_s23 + $0x100] sm:$0xff]  ;;  %v345_v13 = vld [vmem:[%s2356_s23 + $0x118] sm:$0xff] }
  0x8d   : > { %v2515_v14 = vpack.c.bf16 %v355_v7, %v352_v3  ;;  %v2518_v16 = vpack.c.bf16 %v345_v13, %v342_v12  ;;  %v348_v19 = vld [vmem:[%s2356_s23 + $0x130] sm:$0xff]  ;;  %v351_v20 = vld [vmem:[%s2356_s23 + $0x148] sm:$0xff]  ;;  %v2525_v21 = vld [vmem:[#allocation2] sm:$0xff] }
  0x8e   : > { %1515 = vmatpush1.bf16.msra.mxu0 %v2444_v34  ;;  %v2528_v22 = vpack.c.bf16 %v351_v20, %v348_v19  ;;  %v354_v24 = vld [vmem:[%s2356_s23 + $0x160] sm:$0xff]  ;;  %v357_v26 = vld [vmem:[%s2356_s23 + $0x178] sm:$0xff]  ;;  %s1288_s23 = smul.u32 72, %s2061_s22 }
  0x8f   : > { %1517 = vmatprep.subr.bf16.mxu0 %v2451_v37  ;;  %1540 = vmatpush3.bf16.msra.mxu1 %v2464_v47  ;;  %v2536_v27 = vpack.c.bf16 %v357_v26, %v354_v24  ;;  %v2584_v46 = vld [vmem:[%s303_s0] ss:$0 sm:$0xff]  ;;  %s738_s0 = ssub.s32 5, %s2385_s28  ;;  %s1289_s28 = smul.u32 24, %s552_s26 }
  0x90   : > { %1541 = vmatprep.subr.bf16.mxu1 %v2080_v8  ;;  %730 = vperm.xlu0 %1845, %v728_v59   ;;  %s369_s12 = scalar_lea.vmem %s2345_s8, %s1288_s23 [#allocation3]  ;;  %s739_s29 = smul.u32 %s2061_s22, %s738_s0 }
  0x91   : > { %v370_v28 = vld [vmem:[%s369_s12] sm:$0xff]  ;;  %v371_v32 = vld [vmem:[%s369_s12 + $0x8] sm:$0xff]  ;;  %v372_v53 = vld [vmem:[%s369_s12 + $0x10] sm:$0xff]  ;;  %s922_s12 = smul.u32 %s2061_s22, %s921_s14  ;;  %s559_s0 = scalar_lea.vmem %s2345_s8, %s1289_s28 [#allocation3] }
  0x92   : > { %1519 = vmatpush1.bf16.msra.mxu0 %v2460_v45  ;;  %s740_s23 = sadd.s32 %s739_s29, %s737_s7  ;;  %v560_v19 = vld [vmem:[%s559_s0] sm:$0xff]  ;;  %v561_v26 = vld [vmem:[%s559_s0 + $0x8] sm:$0xff]  ;;  %s1275_s7 = sshll.u32 %s2388_s27, 1 }
  0x93   : > { %1521 = vmatprep.subr.bf16.mxu0 %v2472_v49  ;;  %1543 = vmatpush3.bf16.msra.mxu1 %v2488_v58  ;;  %v910_v7 = vstv %s740_s23  ;;  %s923_s18 = sadd.s32 %s922_s12, %s920_s30  ;;  %s736_s10 = sadd.s32 %s2061_s22, %s1275_s7 }
  0x94   : > { %1544 = vmatprep.subr.bf16.mxu1 %v2080_v8  ;;  %vm911_vm4 = vcmp.lt.s32.totalorder %v910_v7, %v2469_v48  ;;  %v1093_v12 = vstv %s923_s18  ;;  %s1290_s29 = smul.u32 24, %s736_s10 }
  0x95   : > { %vm1094_vm5 = vcmp.lt.s32.totalorder %v1093_v12, %v2469_v48  ;;  %s1291_s30 = smul.u32 72, %s2388_s27 }
  0x96   : > { %1523 = vmatpush1.bf16.msra.mxu0 %v2484_v56  ;;  %v1095_v13 = vsel %vm1094_vm5, 1, %v2083_v15  ;;  %s743_s14 = scalar_lea.vmem %s2345_s8, %s1290_s29 [#allocation3] }
  0x97   : > { %1525 = vmatprep.subr.bf16.mxu0 %v2492_v60  ;;  %1546 = vmatpush3.bf16.msra.mxu1 %v2505_v5  ;;  %s926_s23 = scalar_lea.vmem %s2345_s8, %s1291_s30 [#allocation3] }
  0x98   : > { %1547 = vmatprep.subr.bf16.mxu1 %v2080_v8 }
  0x9a   : > { %1527 = vmatpush1.bf16.msra.mxu0 %v2501_v2 }
  0x9b   : > { %1529 = vmatprep.subr.bf16.mxu0 %v2508_v6  ;;  %1549 = vmatpush3.bf16.msra.mxu1 %v2518_v16 }
  0x9c   : > { %1550 = vmatprep.subr.bf16.mxu1 %v2080_v8 }
  0x9e   : > { %1531 = vmatpush1.bf16.msra.mxu0 %v2515_v14 }
  0x9f   : > { %1557 = vmatprep.subr.bf16.mxu0 %v2377_v4  ;;  %1552 = vmatpush3.bf16.msra.mxu1 %v2528_v22 }
  0xa0   : > { %1553 = vmatprep.subr.bf16.mxu1 %v2080_v8 }
  0xa1   : > { %438 = vmatmul.mubr.f32.vlgmr.msra.gmra.mrb[0].mxu0 %v2525_v21 }
  0xa2   : > { %1559 = vmatpush1.bf16.msra.mxu0 %v2390_v10  ;;  %627 = vmatprep.mubr.f32.mxu0 %v2081_v9 }
  0xa3   : > { %1561 = vmatprep.subr.bf16.mxu0 %v2392_v11  ;;  %1555 = vmatpush3.bf16.msra.mxu1 %v2536_v27 }
  0xa4   : > { %1588 = vmatprep.subr.bf16.mxu1 %v2080_v8 }
  0xa6   : > { %1563 = vmatpush1.bf16.msra.mxu0 %v2406_v17  ;;  %1393 = vmatmul.mubr.f32.vlgmr.msra.gmra.mrb[0].mxu1 %v2525_v21 }
  0xa7   : > { %1565 = vmatprep.subr.bf16.mxu0 %v2412_v18  ;;  %1590 = vmatpush3.bf16.msra.mxu1 %v2437_v31 }
  0xa8   : > { %1591 = vmatprep.subr.bf16.mxu1 %v2080_v8  ;;  %1427 = vmatprep.mubr.msk.f32.mxu1 %vm2082_vm0, %v2081_v9 }
  0xaa   : > { %1567 = vmatpush1.bf16.msra.mxu0 %v2426_v23 }
  0xab   : > { %1569 = vmatprep.subr.bf16.mxu0 %v2430_v25  ;;  %1593 = vmatpush3.bf16.msra.mxu1 %v2448_v36 }
  0xac   : > { %1594 = vmatprep.subr.bf16.mxu1 %v2080_v8 }
  0xae   : > { %1571 = vmatpush1.bf16.msra.mxu0 %v2444_v34 }
  0xaf   : > { %1573 = vmatprep.subr.bf16.mxu0 %v2451_v37  ;;  %1596 = vmatpush3.bf16.msra.mxu1 %v2464_v47 }
  0xb0   : > { %1597 = vmatprep.subr.bf16.mxu1 %v2080_v8 }
  0xb2   : > { %1575 = vmatpush1.bf16.msra.mxu0 %v2460_v45 }
  0xb3   : > { %1577 = vmatprep.subr.bf16.mxu0 %v2472_v49  ;;  %1599 = vmatpush3.bf16.msra.mxu1 %v2488_v58 }
  0xb4   : > { %1600 = vmatprep.subr.bf16.mxu1 %v2080_v8 }
  0xb6   : > { %1579 = vmatpush1.bf16.msra.mxu0 %v2484_v56 }
  0xb7   : > { %1581 = vmatprep.subr.bf16.mxu0 %v2492_v60  ;;  %1602 = vmatpush3.bf16.msra.mxu1 %v2505_v5 }
  0xb8   : > { %1603 = vmatprep.subr.bf16.mxu1 %v2080_v8 }
  0xba   : > { %1583 = vmatpush1.bf16.msra.mxu0 %v2501_v2 }
  0xbb   : > { %1585 = vmatprep.subr.bf16.mxu0 %v2508_v6  ;;  %1605 = vmatpush3.bf16.msra.mxu1 %v2518_v16 }
  0xbc   : > { %1606 = vmatprep.subr.bf16.mxu1 %v2080_v8 }
  0xbe   : > { %1587 = vmatpush1.bf16.msra.mxu0 %v2515_v14 }
  0xbf   : > { %1613 = vmatprep.subr.bf16.mxu0 %v2377_v4  ;;  %1608 = vmatpush3.bf16.msra.mxu1 %v2528_v22 }
  0xc0   : > { %1609 = vmatprep.subr.bf16.mxu1 %v2080_v8 }
  0xc3   : > { %1611 = vmatpush3.bf16.msra.mxu1 %v2536_v27 }
  0xc4   : > { %1644 = vmatprep.subr.bf16.mxu1 %v2080_v8 }
 0x10b   : > { %v547_v0 = vpop.permute.xlu0 %546 }
 0x10c   : > { %vm548_vm3 = vcmp.eq.s32.totalorder %v547_v0, 1 }
 0x174   : > { %v439_v29 = vpop.f32.mrb[0].mxu0 }
 0x175   : > { %v514_v30 = vadd.f32 %v439_v29, %v370_v28  ;;  %v441_v33 = vpop.f32.mrb[1].mxu0 }
 0x176   : > { %v521_v38 = vadd.f32 %v441_v33, %v371_v32 }
 0x177   : > { %v1268_v35 = vmul.f32 -1.442695, %v514_v30 }
 0x178   : > { %v1269_v39 = vmul.f32 -1.442695, %v521_v38 }
 0x179   : > { %1847 = vpow2.f32 %v1268_v35  ;;  %v510_v40 = vpop.f32.mrb[0].mxu1 }
 0x17a   : > { %v1394_v41 = vpop.f32.mrb[1].mxu1  ;;  %1849 = vpow2.f32 %v1269_v39  ;;  %v534_v51 = vadd.f32 %v2584_v46, %v510_v40 }
 0x17b   : > { %v562_v41 = vld [vmem:[%s559_s0 + $0x10] sm:$0xff] }
 0x183   : > { %v1848_v42 = vpop.eup %1847 }
 0x184   : > { %v518_v43 = vadd.f32 1.0, %v1848_v42  ;;  %v1850_v44 = vpop.eup %1849 }
 0x185   : > { %v525_v50 = vadd.f32 1.0, %v1850_v44 }
 0x186   : > { %1851 = vrcp.f32 %v518_v43 }
 0x187   : > { %1853 = vrcp.f32 %v525_v50 }
 0x190   : > { %v1852_v52 = vpop.eup %1851 }
 0x191   : > { %v535_v54 = vmul.f32 %v1852_v52, %v534_v51  ;;  %v1854_v57 = vpop.eup %1853  ;;  %v731_v52 = vpop.permute.xlu0 %730 }
 0x192   : > { %v538_v59 = vsub.f32 1.0, %v1854_v57  ;;  %v540_v63 = vmul.f32 %v1854_v57, %v2525_v21  ;;  %vm732_vm6 = vcmp.eq.s32.totalorder %v731_v52, 1 }
 0x193   : > { %v536_v55 = vadd.f32 %v535_v54, %v372_v53 }
 0x195   : > { %1855 = vtanh.f32 %v536_v55 }
 0x19f   : > { %v1856_v61 = vpop.eup %1855 }
 0x1a0   : > { %v539_v62 = vmul.f32 %v1856_v61, %v538_v59 }
 0x1a2   : > { %v541_v1 = vadd.f32 %v540_v63, %v539_v62  ;;  %v927_v62 = vld [vmem:[%s926_s23] sm:$0xff] }
 0x1a4   : > { %v2589_v3 = vsel %vm548_vm3, %v541_v1, %v2525_v21 }
 0x1a5   : > { %628 = vmatmul.mubr.f32.vlgmr.msra.gmra.mrb[2].mxu0 %v2589_v3  ;;  %1428 = vmatmul.mubr.f32.vlgmr.msra.gmra.mrb[2].mxu1 %v2589_v3 }
 0x1a6   : > { %1615 = vmatpush1.bf16.msra.mxu0 %v2390_v10  ;;  %1646 = vmatpush3.bf16.msra.mxu1 %v2437_v31 }
 0x1a7   : > { %1617 = vmatprep.subr.bf16.mxu0 %v2392_v11  ;;  %1647 = vmatprep.subr.bf16.mxu1 %v2080_v8 }
 0x1a8   : > { %811 = vmatprep.mubr.f32.mxu0 %v2081_v9  ;;  %1462 = vmatprep.mubr.msk.f32.mxu1 %vm2082_vm0, %v2081_v9 }
 0x1aa   : > { %1619 = vmatpush1.bf16.msra.mxu0 %v2406_v17  ;;  %1649 = vmatpush3.bf16.msra.mxu1 %v2448_v36 }
 0x1ab   : > { %1621 = vmatprep.subr.bf16.mxu0 %v2412_v18  ;;  %1650 = vmatprep.subr.bf16.mxu1 %v2080_v8 }
 0x1ae   : > { %1623 = vmatpush1.bf16.msra.mxu0 %v2426_v23  ;;  %1652 = vmatpush3.bf16.msra.mxu1 %v2464_v47 }
 0x1af   : > { %1625 = vmatprep.subr.bf16.mxu0 %v2430_v25  ;;  %1653 = vmatprep.subr.bf16.mxu1 %v2080_v8 }
 0x1b2   : > { %1627 = vmatpush1.bf16.msra.mxu0 %v2444_v34  ;;  %1655 = vmatpush3.bf16.msra.mxu1 %v2488_v58 }
 0x1b3   : > { %1629 = vmatprep.subr.bf16.mxu0 %v2451_v37  ;;  %1656 = vmatprep.subr.bf16.mxu1 %v2080_v8 }
 0x1b6   : > { %1631 = vmatpush1.bf16.msra.mxu0 %v2460_v45  ;;  %1658 = vmatpush3.bf16.msra.mxu1 %v2505_v5 }
 0x1b7   : > { %1633 = vmatprep.subr.bf16.mxu0 %v2472_v49  ;;  %1659 = vmatprep.subr.bf16.mxu1 %v2080_v8 }
 0x1ba   : > { %1635 = vmatpush1.bf16.msra.mxu0 %v2484_v56  ;;  %1661 = vmatpush3.bf16.msra.mxu1 %v2518_v16 }
 0x1bb   : > { %1637 = vmatprep.subr.bf16.mxu0 %v2492_v60  ;;  %1662 = vmatprep.subr.bf16.mxu1 %v2080_v8 }
 0x1be   : > { %1639 = vmatpush1.bf16.msra.mxu0 %v2501_v2  ;;  %1664 = vmatpush3.bf16.msra.mxu1 %v2528_v22 }
 0x1bf   : > { %1641 = vmatprep.subr.bf16.mxu0 %v2508_v6  ;;  %1665 = vmatprep.subr.bf16.mxu1 %v2080_v8 }
 0x1c2   : > { %1643 = vmatpush1.bf16.msra.mxu0 %v2515_v14  ;;  %1667 = vmatpush3.bf16.msra.mxu1 %v2536_v27 }
 0x1c3   : > { %1669 = vmatprep.subr.bf16.mxu0 %v2377_v4  ;;  %1700 = vmatprep.subr.bf16.mxu1 %v2080_v8  ;;  %v912_v4 = vsel %vm911_vm4, 1, %v2083_v15 }
 0x1c4   : > { %914 = vperm.xlu1 %1846, %v912_v4  }
 0x1c8   : > { %1097 = vperm.xlu1 %1846, %v1095_v13  }
 0x278   : > { %v629_v20 = vpop.f32.mrb[2].mxu0  ;;  %v700_v21 = vpop.f32.mrb[2].mxu1 }
 0x279   : > { %v704_v24 = vadd.f32 %v629_v20, %v560_v19  ;;  %v631_v28 = vpop.f32.mrb[3].mxu0  ;;  %v1429_v29 = vpop.f32.mrb[3].mxu1  ;;  %v718_v39 = vadd.f32 %v2584_v46, %v700_v21 }
 0x27a   : > { %v711_v32 = vadd.f32 %v631_v28, %v561_v26 }
 0x27b   : > { %v1273_v30 = vmul.f32 -1.442695, %v704_v24 }
 0x27c   : > { %v1274_v33 = vmul.f32 -1.442695, %v711_v32 }
 0x27d   : > { %1857 = vpow2.f32 %v1273_v30  ;;  %v929_v30 = vld [vmem:[%s926_s23 + $0x10] sm:$0xff] }
 0x27e   : > { %1859 = vpow2.f32 %v1274_v33 }
 0x287   : > { %v1858_v48 = vpop.eup %1857 }
 0x288   : > { %v708_v35 = vadd.f32 1.0, %v1858_v48  ;;  %v1860_v15 = vpop.eup %1859 }
 0x289   : > { %v715_v38 = vadd.f32 1.0, %v1860_v15 }
 0x28a   : > { %1861 = vrcp.f32 %v708_v35 }
 0x28b   : > { %1863 = vrcp.f32 %v715_v38 }
 0x294   : > { %v1862_v40 = vpop.eup %1861 }
 0x295   : > { %v719_v42 = vmul.f32 %v1862_v40, %v718_v39  ;;  %v1864_v44 = vpop.eup %1863 }
 0x296   : > { %v722_v50 = vsub.f32 1.0, %v1864_v44  ;;  %v724_v54 = vmul.f32 %v1864_v44, %v2589_v3 }
 0x297   : > { %v720_v43 = vadd.f32 %v719_v42, %v562_v41 }
 0x299   : > { %1865 = vtanh.f32 %v720_v43 }
 0x2a3   : > { %v1866_v51 = vpop.eup %1865 }
 0x2a4   : > { %v723_v53 = vmul.f32 %v1866_v51, %v722_v50 }
 0x2a6   : > { %v725_v55 = vadd.f32 %v724_v54, %v723_v53 }
 0x2a8   : > { %v2646_v57 = vsel %vm732_vm6, %v725_v55, %v2589_v3  ;;  %v928_v3 = vld [vmem:[%s926_s23 + $0x8] sm:$0xff] }
 0x2a9   : > { %812 = vmatmul.mubr.f32.vlgmr.msra.gmra.mrb[4].mxu0 %v2646_v57  ;;  %1463 = vmatmul.mubr.f32.vlgmr.msra.gmra.mrb[4].mxu1 %v2646_v57 }
 0x2aa   : > { %1671 = vmatpush1.bf16.msra.mxu0 %v2390_v10  ;;  %1702 = vmatpush3.bf16.msra.mxu1 %v2437_v31 }
 0x2ab   : > { %1673 = vmatprep.subr.bf16.mxu0 %v2392_v11  ;;  %1703 = vmatprep.subr.bf16.mxu1 %v2080_v8 }
 0x2ac   : > { %994 = vmatprep.mubr.f32.mxu0 %v2081_v9  ;;  %1497 = vmatprep.mubr.msk.f32.mxu1 %vm2082_vm0, %v2081_v9  ;;  %v744_v9 = vld [vmem:[%s743_s14] sm:$0xff] }
 0x2ae   : > { %1675 = vmatpush1.bf16.msra.mxu0 %v2406_v17  ;;  %1705 = vmatpush3.bf16.msra.mxu1 %v2448_v36 }
 0x2af   : > { %1677 = vmatprep.subr.bf16.mxu0 %v2412_v18  ;;  %1706 = vmatprep.subr.bf16.mxu1 %v2080_v8  ;;  %v745_v18 = vld [vmem:[%s743_s14 + $0x8] sm:$0xff] }
 0x2b2   : > { %1679 = vmatpush1.bf16.msra.mxu0 %v2426_v23  ;;  %1708 = vmatpush3.bf16.msra.mxu1 %v2464_v47 }
 0x2b3   : > { %1681 = vmatprep.subr.bf16.mxu0 %v2430_v25  ;;  %1709 = vmatprep.subr.bf16.mxu1 %v2080_v8 }
 0x2b6   : > { %1683 = vmatpush1.bf16.msra.mxu0 %v2444_v34  ;;  %1711 = vmatpush3.bf16.msra.mxu1 %v2488_v58  ;;  %v746_v58 = vld [vmem:[%s743_s14 + $0x10] sm:$0xff] }
 0x2b7   : > { %1685 = vmatprep.subr.bf16.mxu0 %v2451_v37  ;;  %1712 = vmatprep.subr.bf16.mxu1 %v2080_v8 }
 0x2ba   : > { %1687 = vmatpush1.bf16.msra.mxu0 %v2460_v45  ;;  %1714 = vmatpush3.bf16.msra.mxu1 %v2505_v5 }
 0x2bb   : > { %1689 = vmatprep.subr.bf16.mxu0 %v2472_v49  ;;  %1715 = vmatprep.subr.bf16.mxu1 %v2080_v8 }
 0x2be   : > { %1691 = vmatpush1.bf16.msra.mxu0 %v2484_v56  ;;  %1717 = vmatpush3.bf16.msra.mxu1 %v2518_v16  ;;  %v915_v16 = vpop.permute.xlu1 %914 }
 0x2bf   : > { %1693 = vmatprep.subr.bf16.mxu0 %v2492_v60  ;;  %1718 = vmatprep.subr.bf16.mxu1 %v2080_v8  ;;  %vm916_vm7 = vcmp.eq.s32.totalorder %v915_v16, 1 }
 0x2c2   : > { %1695 = vmatpush1.bf16.msra.mxu0 %v2501_v2  ;;  %1720 = vmatpush3.bf16.msra.mxu1 %v2528_v22  ;;  %v1098_v38 = vpop.permute.xlu1 %1097 }
 0x2c3   : > { %1697 = vmatprep.subr.bf16.mxu0 %v2508_v6  ;;  %1721 = vmatprep.subr.bf16.mxu1 %v2080_v8  ;;  %vm1099_vm8 = vcmp.eq.s32.totalorder %v1098_v38, 1 }
 0x2c6   : > { %1699 = vmatpush1.bf16.msra.mxu0 %v2515_v14  ;;  %1723 = vmatpush3.bf16.msra.mxu1 %v2536_v27 }
 0x37c   : > { %v813_v10 = vpop.f32.mrb[4].mxu0  ;;  %v884_v11 = vpop.f32.mrb[4].mxu1 }
 0x37d   : > { %v888_v17 = vadd.f32 %v813_v10, %v744_v9  ;;  %v815_v23 = vpop.f32.mrb[5].mxu0  ;;  %v1464_v25 = vpop.f32.mrb[5].mxu1  ;;  %v902_v49 = vadd.f32 %v2584_v46, %v884_v11 }
 0x37e   : > { %v895_v34 = vadd.f32 %v815_v23, %v745_v18 }
 0x37f   : > { %v1277_v31 = vmul.f32 -1.442695, %v888_v17 }
 0x380   : > { %v1278_v36 = vmul.f32 -1.442695, %v895_v34 }
 0x381   : > { %1867 = vpow2.f32 %v1277_v31 }
 0x382   : > { %1869 = vpow2.f32 %v1278_v36 }
 0x38b   : > { %v1868_v8 = vpop.eup %1867 }
 0x38c   : > { %v892_v37 = vadd.f32 1.0, %v1868_v8  ;;  %v1870_v45 = vpop.eup %1869 }
 0x38d   : > { %v899_v47 = vadd.f32 1.0, %v1870_v45 }
 0x38e   : > { %1871 = vrcp.f32 %v892_v37 }
 0x38f   : > { %1873 = vrcp.f32 %v899_v47 }
 0x398   : > { %v1872_v56 = vpop.eup %1871 }
 0x399   : > { %v903_v60 = vmul.f32 %v1872_v56, %v902_v49  ;;  %v1874_v5 = vpop.eup %1873 }
 0x39a   : > { %v906_v6 = vsub.f32 1.0, %v1874_v5  ;;  %v908_v27 = vmul.f32 %v1874_v5, %v2646_v57 }
 0x39b   : > { %v904_v2 = vadd.f32 %v903_v60, %v746_v58 }
 0x39d   : > { %1875 = vtanh.f32 %v904_v2 }
 0x3a7   : > { %v1876_v14 = vpop.eup %1875 }
 0x3a8   : > { %v907_v22 = vmul.f32 %v1876_v14, %v906_v6 }
 0x3aa   : > { %v909_v59 = vadd.f32 %v908_v27, %v907_v22 }
 0x3ac   : > { %v917_v61 = vsel %vm916_vm7, %v909_v59, %v2646_v57 }
 0x3ad   : > { %995 = vmatmul.mubr.f32.vlgmr.msra.gmra.mrb[6].mxu0 %v917_v61  ;;  %1498 = vmatmul.mubr.f32.vlgmr.msra.gmra.mrb[6].mxu1 %v917_v61 }
 0x480   : > { %v996_v63 = vpop.f32.mrb[6].mxu0  ;;  %v1067_v0 = vpop.f32.mrb[6].mxu1 }
 0x481   : > { %v1071_v1 = vadd.f32 %v996_v63, %v927_v62  ;;  %v998_v7 = vpop.f32.mrb[7].mxu0  ;;  %v1499_v4 = vpop.f32.mrb[7].mxu1  ;;  %v1085_v28 = vadd.f32 %v2584_v46, %v1067_v0 }
 0x482   : > { %v1078_v13 = vadd.f32 %v998_v7, %v928_v3 }
 0x483   : > { %v1281_v12 = vmul.f32 -1.442695, %v1071_v1 }
 0x484   : > { %v1282_v19 = vmul.f32 -1.442695, %v1078_v13 }
 0x485   : > { %1877 = vpow2.f32 %v1281_v12 }
 0x486   : > { %1879 = vpow2.f32 %v1282_v19 }
 0x48f   : > { %v1878_v20 = vpop.eup %1877 }
 0x490   : > { %v1075_v21 = vadd.f32 1.0, %v1878_v20  ;;  %v1880_v24 = vpop.eup %1879 }
 0x491   : > { %v1082_v26 = vadd.f32 1.0, %v1880_v24 }
 0x492   : > { %1881 = vrcp.f32 %v1075_v21 }
 0x493   : > { %1883 = vrcp.f32 %v1082_v26 }
 0x49c   : > { %v1882_v29 = vpop.eup %1881 }
 0x49d   : > { %v1086_v32 = vmul.f32 %v1882_v29, %v1085_v28  ;;  %v1884_v48 = vpop.eup %1883 }
 0x49e   : > { %v1089_v35 = vsub.f32 1.0, %v1884_v48  ;;  %v1091_v40 = vmul.f32 %v1884_v48, %v917_v61 }
 0x49f   : > { %v1087_v33 = vadd.f32 %v1086_v32, %v929_v30 }
 0x4a1   : > { %1885 = vtanh.f32 %v1087_v33 }
 0x4ab   : > { %v1886_v15 = vpop.eup %1885  ;;  %1105 = sbr.rel (%p1283_p7) target bundleno = 1210 (0x4ba), region = 52 }
 0x4ac   : > { %v1090_v39 = vmul.f32 %v1886_v15, %v1089_v35 }
 0x4ae   : > { %v1092_v41 = vadd.f32 %v1091_v40, %v1090_v39 }
 0x4b0   : > { %v1100_v42 = vsel %vm1099_vm8, %v1092_v41, %v917_v61 }
 0x4b1   : > { %1101 = vst [vmem:[#allocation2] sm:$0xff] %v1100_v42 }
 0x4b8   : > { %v1106_v46 = vld [vmem:[#allocation2] sm:$0xff] }
 0x4b9   : > { %1107 = vst [vmem:[%s2371_s24] sm:$0xff] %v1106_v46 }
 0x4ba PF: > { %s1285_s8 = sshll.u32 %s2061_s22, 7  ;;  %s1122_s6 = sshll.u32 %s2371_s24, 4  ;;  %s1123_s6 = int_to_ptr.vmem [resolvable:$true] %s1122_s6 }
 0x4bb   : > { %s2698_s18 = scalar_lea.hbm %s2760_s4, %s1285_s8  ;;  %s1109_s26 = scalar_lea.sflag [#allocation5], %s2352_s5 }
 0x4bc   : > { %s1947_s28 = scalar_lea.vmem %s1123_s6, 128  ;;  %p2797_p1 = scmp.ne.s32.totalorder %s2789_s9, 0 }
 0x4bd   : > { %p1948_p10 = scmp.ne.s32.totalorder %s1123_s6, %s1947_s28  ;;  %s2084_s21 = smov [#allocation8]  }
 0x4be   : > { %s1951_s0 = sshll.u32 %s2084_s21, 4  ;;  %s1952_s0 = int_to_ptr.vmem [resolvable:$false] %s1951_s0 }
 0x4bf   : > { %p1949_p11 = pnand %p1948_p10, %p2797_p1  ;;  %s1953_s7 = scalar_lea.vmem %s1952_s0, 256 }
 0x4c0   : > { %p1954_p6 = scmp.lt.s32.totalorder %s1123_s6, %s1952_s0  ;;  %p1955_p13 = scmp.lt.s32.totalorder %s1953_s7, %s1947_s28 }
 0x4c1   : > { %p1950_p3 = pneg %p1949_p11 }
 0x4c2   : > { %p1956_p9 = por %p1955_p13, %p1954_p6 }
 0x4c4   : > { %p1957_p12 = pnand %p1956_p9, %p1950_p3 }
 0x4c6   : > { %1960 = shalt.err (!%p1957_p12)
}
 0x4c7   : > { %s1961_s22 = scalar_lea.hbm %s2698_s18, 128  ;;  %s1965_s10 = scalar_lea.hbm %s2760_s4, 256 }
 0x4c8   : > { %p1962_p0 = scmp.ne.s32.totalorder %s2698_s18, %s1961_s22  ;;  %p1966_p4 = scmp.lt.u32.totalorder %s2698_s18, %s2760_s4 }
 0x4c9   : > { %p1967_p5 = scmp.lt.u32.totalorder %s1965_s10, %s1961_s22  ;;  %p1969_p10 = scmp.lt.u32.totalorder %s1961_s22, %s2698_s18 }
 0x4ca   : > { %p1963_p2 = pnand %p1962_p0, %p2797_p1 }
 0x4cb   : > { %p1968_p7 = por %p1967_p5, %p1966_p4 }
 0x4cc   : > { %p1964_p8 = pneg %p1963_p2 }
 0x4cd   : > { %p1970_p11 = por %p1969_p10, %p1968_p7 }
 0x4cf   : > { %p1971_p3 = pnand %p1970_p11, %p1964_p8 }
 0x4d1   : > { %1974 = shalt.err (!%p1971_p3)
}
 0x4d2   : > { %1735 = dma.vmem_to_hbm [thread:$0]  (%p2797_p1), %s1123_s6, 128, %s2698_s18, %s1109_s26  }
 0x4d3 PF: > { %p1749_p6 = scmp.ge.s32.totalorder %s2073_s25, 2  ;;  %s1134_s30 = sand.u32 1, %s2033_s15  }
 0x4d4   : > { %p2798_p13 = scmp.ne.s32.totalorder %s2790_s11, 0  ;;  %s1135_s23 = scalar_lea.sflag [#allocation5], %s1134_s30 }
 0x4d6   : > { %p1745_p9 = pnand %p1749_p6, %p2798_p13 }
 0x4d8   : > { %2028 = dma.done.wait (!%p1745_p9), %s1135_s23, 128  }
 0x4d9   : > { %2030 = vsyncadd (!%p1745_p9), %s1135_s23, 4294967168  ;;  %s23_s25 = sadd.s32 1, %s2073_s25   ;;  %s2799_s9 = sld [smem:[#allocation16_spill]] }
 0x4da   : > { %p20_p12 = scmp.ge.s32.totalorder %s23_s25, 6   ;;  %s2800_s21 = sld [smem:[#allocation12_spill]] }
 0x4db   : > { %s2801_s22 = sld [smem:[#allocation13_spill]]  ;;  %s2802_s23 = sld [smem:[#allocation14_spill]] }
 0x4dc   : > { %s2803_s24 = sld [smem:[#allocation15_spill]]  ;;  %s2804_s15 = smov %s2037_s16 }
 0x4dd   : > { %s2805_s16 = smov %s2041_s17  ;;  %s2806_s17 = smov %s2274_s13 }
 0x4de   : > { %s2807_s18 = smov %s2049_s19  ;;  %s2808_s19 = smov %s2053_s20 }
 0x4df   : > { %s2809_s20 = smov %s2799_s9  ;;  %22 = sbr.rel (!%p20_p12) target bundleno = 13 (0xd), region = 109 }
 0x4e6   :  { %1140 = vsyncpa [#allocation4], 1 }
 0x4e7   :  { %1142 = vsyncpa [#allocation4 + $0x1], 1 }
 0x4e8   :  { %1143 = vsyncpa [#allocation7], 1 }
 0x4e9   :  { %1145 = vsyncpa [#allocation7 + $0x1], 1 }
 0x4ea   :  { %1146 = vsyncpa [#allocation5], 1 }
 0x4eb   :  { %1148 = vsyncpa [#allocation5 + $0x1], 1 }

</bundles_post_ra>
